<compile_context>
chip_gen: v5e
topology: v5e:2x2
jax: 0.10.0
libtpu: 0.0.40
codegen_flags: <defaults>
</compile_context>

<pallas_src>
import jax
import jax.numpy as jnp
from jax.experimental import pallas as pl
from jax.experimental.pallas import tpu as pltpu

EPS = 1e-5
_LANE_CHUNK = 128  # one lane tile per slab; bounds live vreg usage


def _bn_block(x_ref, g_ref, b_ref, o_ref, out_off, c0, ci, inv_m):
    """Normalize channels [c0, c0+ci) of x_ref into o_ref[:, out_off+c0 : +ci)."""
    x = x_ref[:, c0:c0 + ci]                                 # (M, ci)
    mean = jnp.sum(x, axis=0, keepdims=True) * inv_m         # (1, ci) sublane reduce
    d = x - mean
    var = jnp.sum(d * d, axis=0, keepdims=True) * inv_m      # centered two-pass var
    inv_std = jax.lax.rsqrt(var + EPS)                       # EUP, off the VALU path
    lo = out_off + c0
    scale = g_ref[:, lo:lo + ci] * inv_std                   # (1, ci)
    shift = b_ref[:, lo:lo + ci]
    o_ref[:, lo:lo + ci] = d * scale + shift                 # dense/aligned stores


def _cat_bn_kernel(x1_ref, x2_ref, x3_ref, x4_ref, g_ref, b_ref, o_ref):
    inv_m = jnp.float32(1.0 / x1_ref.shape[0])               # 1 / (N*H*W)
    off = 0
    for x_ref in (x1_ref, x2_ref, x3_ref, x4_ref):
        c_total = x_ref.shape[1]
        for c0 in range(0, c_total, _LANE_CHUNK):            # static unrolled slabs
            ci = min(_LANE_CHUNK, c_total - c0)
            _bn_block(x_ref, g_ref, b_ref, o_ref, off, c0, ci, inv_m)
        off += c_total


def cat_batchnorm(x369, x376, x383, x390, gamma, beta):
    """x*: NCHW float32 arrays. Returns NCHW float32 of shape (N, C_total, H, W)."""
    N, _, H, W = x369.shape
    M = N * H * W

    def to_mc(x):
        # NCHW -> (N*H*W, C): lane-dense channel layout (pure layout plumbing).
        n, c, h, w = x.shape
        return jnp.transpose(x.reshape(n, c, h * w), (0, 2, 1)).reshape(n * h * w, c)

    xs = [to_mc(x) for x in (x369, x376, x383, x390)]
    C = sum(x.shape[1] for x in xs)

    g = gamma.reshape(1, C).astype(jnp.float32)               # (1, C) row vectors
    b = beta.reshape(1, C).astype(jnp.float32)

    # Tiny working set (<1 MB padded): single whole-array invocation, no grid.
    out_mc = pl.pallas_call(
        _cat_bn_kernel,
        out_shape=jax.ShapeDtypeStruct((M, C), jnp.float32),
        in_specs=[pl.BlockSpec(memory_space=pltpu.VMEM)] * 6,
        out_specs=pl.BlockSpec(memory_space=pltpu.VMEM),
    )(*xs, g, b)

    # (N*H*W, C) -> NCHW
    return jnp.transpose(out_mc.reshape(N, H * W, C), (0, 2, 1)).reshape(N, C, H, W)


# TODO(synk): training-mode running_mean/running_var updates (momentum=0.1,
# unbiased variance) are not produced; the kernel always normalizes with the
# current batch statistics (PyTorch train-mode forward output only).

if __name__ == "__main__":
    key = jax.random.PRNGKey(0)
    k1, k2, k3, k4 = jax.random.split(key, 4)

    # Shapes taken directly from the PyTorch module (already small).
    x369 = jax.random.normal(k1, (1, 640, 7, 7), dtype=jnp.float32)
    x376 = jax.random.normal(k2, (1, 32, 7, 7), dtype=jnp.float32)
    x383 = jax.random.normal(k3, (1, 32, 7, 7), dtype=jnp.float32)
    x390 = jax.random.normal(k4, (1, 32, 7, 7), dtype=jnp.float32)

    C_total = 640 + 32 + 32 + 32  # 736
    # PyTorch BatchNorm2d default affine init: weight=1, bias=0 (perturb a bit).
    gamma = jnp.ones((C_total,), dtype=jnp.float32)
    beta = jnp.zeros((C_total,), dtype=jnp.float32)

    out = cat_batchnorm(x369, x376, x383, x390, gamma, beta)
    jax.block_until_ready(out)

    # Sanity check against a plain-JAX reference of the same semantics.
    ref_cat = jnp.concatenate([x369, x376, x383, x390], axis=1)
    mean = jnp.mean(ref_cat, axis=(0, 2, 3), keepdims=True)
    var = jnp.mean((ref_cat - mean) ** 2, axis=(0, 2, 3), keepdims=True)
    ref = (ref_cat - mean) / jnp.sqrt(var + EPS) * gamma.reshape(1, -1, 1, 1) \
          + beta.reshape(1, -1, 1, 1)
    assert out.shape == (1, 736, 7, 7)
    assert jnp.max(jnp.abs(out - ref)) < 1e-4

    print("KERNEL_OK")
</pallas_src>

<mosaic_0001>
module attributes {stable_mosaic.version = 11 : i64} {
  func.func @_cat_bn_kernel(%arg0: memref<49x640xf32, #tpu.memory_space<vmem>>, %arg1: memref<49x32xf32, #tpu.memory_space<vmem>>, %arg2: memref<49x32xf32, #tpu.memory_space<vmem>>, %arg3: memref<49x32xf32, #tpu.memory_space<vmem>>, %arg4: memref<1x736xf32, #tpu.memory_space<vmem>>, %arg5: memref<1x736xf32, #tpu.memory_space<vmem>>, %arg6: memref<49x736xf32, #tpu.memory_space<vmem>>) attributes {dimension_semantics = [], scalar_prefetch = 0 : i64, scratch_operands = 0 : i64, tpu.core_type = #tpu.core_type<tc>} {
    %c0 = arith.constant 0 : index
    %c0_0 = arith.constant 0 : index
    %0 = vector.load %arg0[%c0, %c0_0] : memref<49x640xf32, #tpu.memory_space<vmem>>, vector<49x128xf32>
    %cst = arith.constant dense<0.000000e+00> : vector<128xf32>
    %1 = vector.multi_reduction <add>, %0, %cst [0] : vector<49x128xf32> to vector<128xf32>
    %2 = vector.shape_cast %1 : vector<128xf32> to vector<1x128xf32>
    %cst_1 = arith.constant 0.0204081628 : f32
    %3 = vector.broadcast %cst_1 : f32 to vector<1x128xf32>
    %4 = arith.mulf %2, %3 : vector<1x128xf32>
    %5 = vector.broadcast %4 : vector<1x128xf32> to vector<49x128xf32>
    %6 = arith.subf %0, %5 : vector<49x128xf32>
    %7 = arith.mulf %6, %6 : vector<49x128xf32>
    %cst_2 = arith.constant dense<0.000000e+00> : vector<128xf32>
    %8 = vector.multi_reduction <add>, %7, %cst_2 [0] : vector<49x128xf32> to vector<128xf32>
    %9 = vector.shape_cast %8 : vector<128xf32> to vector<1x128xf32>
    %cst_3 = arith.constant 0.0204081628 : f32
    %10 = vector.broadcast %cst_3 : f32 to vector<1x128xf32>
    %11 = arith.mulf %9, %10 : vector<1x128xf32>
    %cst_4 = arith.constant 9.99999974E-6 : f32
    %12 = vector.broadcast %cst_4 : f32 to vector<1x128xf32>
    %13 = arith.addf %11, %12 : vector<1x128xf32>
    %14 = math.rsqrt %13 : vector<1x128xf32>
    %c0_5 = arith.constant 0 : index
    %c0_6 = arith.constant 0 : index
    %15 = vector.load %arg4[%c0_5, %c0_6] : memref<1x736xf32, #tpu.memory_space<vmem>>, vector<1x128xf32>
    %16 = arith.mulf %15, %14 : vector<1x128xf32>
    %c0_7 = arith.constant 0 : index
    %c0_8 = arith.constant 0 : index
    %17 = vector.load %arg5[%c0_7, %c0_8] : memref<1x736xf32, #tpu.memory_space<vmem>>, vector<1x128xf32>
    %18 = vector.broadcast %16 : vector<1x128xf32> to vector<49x128xf32>
    %19 = arith.mulf %6, %18 : vector<49x128xf32>
    %20 = vector.broadcast %17 : vector<1x128xf32> to vector<49x128xf32>
    %21 = arith.addf %19, %20 : vector<49x128xf32>
    %c0_9 = arith.constant 0 : index
    %c0_10 = arith.constant 0 : index
    %22 = vector.load %arg6[%c0_9, %c0_10] : memref<49x736xf32, #tpu.memory_space<vmem>>, vector<49x128xf32>
    tpu.vector_store %arg6[%c0_9, %c0_10], %21 {strides = array<i32>} : memref<49x736xf32, #tpu.memory_space<vmem>>, vector<49x128xf32>,
    %c0_11 = arith.constant 0 : index
    %c128 = arith.constant 128 : index
    %23 = vector.load %arg0[%c0_11, %c128] : memref<49x640xf32, #tpu.memory_space<vmem>>, vector<49x128xf32>
    %cst_12 = arith.constant dense<0.000000e+00> : vector<128xf32>
    %24 = vector.multi_reduction <add>, %23, %cst_12 [0] : vector<49x128xf32> to vector<128xf32>
    %25 = vector.shape_cast %24 : vector<128xf32> to vector<1x128xf32>
    %cst_13 = arith.constant 0.0204081628 : f32
    %26 = vector.broadcast %cst_13 : f32 to vector<1x128xf32>
    %27 = arith.mulf %25, %26 : vector<1x128xf32>
    %28 = vector.broadcast %27 : vector<1x128xf32> to vector<49x128xf32>
    %29 = arith.subf %23, %28 : vector<49x128xf32>
    %30 = arith.mulf %29, %29 : vector<49x128xf32>
    %cst_14 = arith.constant dense<0.000000e+00> : vector<128xf32>
    %31 = vector.multi_reduction <add>, %30, %cst_14 [0] : vector<49x128xf32> to vector<128xf32>
    %32 = vector.shape_cast %31 : vector<128xf32> to vector<1x128xf32>
    %cst_15 = arith.constant 0.0204081628 : f32
    %33 = vector.broadcast %cst_15 : f32 to vector<1x128xf32>
    %34 = arith.mulf %32, %33 : vector<1x128xf32>
    %cst_16 = arith.constant 9.99999974E-6 : f32
    %35 = vector.broadcast %cst_16 : f32 to vector<1x128xf32>
    %36 = arith.addf %34, %35 : vector<1x128xf32>
    %37 = math.rsqrt %36 : vector<1x128xf32>
    %c0_17 = arith.constant 0 : index
    %c128_18 = arith.constant 128 : index
    %38 = vector.load %arg4[%c0_17, %c128_18] : memref<1x736xf32, #tpu.memory_space<vmem>>, vector<1x128xf32>
    %39 = arith.mulf %38, %37 : vector<1x128xf32>
    %c0_19 = arith.constant 0 : index
    %c128_20 = arith.constant 128 : index
    %40 = vector.load %arg5[%c0_19, %c128_20] : memref<1x736xf32, #tpu.memory_space<vmem>>, vector<1x128xf32>
    %41 = vector.broadcast %39 : vector<1x128xf32> to vector<49x128xf32>
    %42 = arith.mulf %29, %41 : vector<49x128xf32>
    %43 = vector.broadcast %40 : vector<1x128xf32> to vector<49x128xf32>
    %44 = arith.addf %42, %43 : vector<49x128xf32>
    %c0_21 = arith.constant 0 : index
    %c128_22 = arith.constant 128 : index
    %45 = vector.load %arg6[%c0_21, %c128_22] : memref<49x736xf32, #tpu.memory_space<vmem>>, vector<49x128xf32>
    tpu.vector_store %arg6[%c0_21, %c128_22], %44 {strides = array<i32>} : memref<49x736xf32, #tpu.memory_space<vmem>>, vector<49x128xf32>,
    %c0_23 = arith.constant 0 : index
    %c256 = arith.constant 256 : index
    %46 = vector.load %arg0[%c0_23, %c256] : memref<49x640xf32, #tpu.memory_space<vmem>>, vector<49x128xf32>
    %cst_24 = arith.constant dense<0.000000e+00> : vector<128xf32>
    %47 = vector.multi_reduction <add>, %46, %cst_24 [0] : vector<49x128xf32> to vector<128xf32>
    %48 = vector.shape_cast %47 : vector<128xf32> to vector<1x128xf32>
    %cst_25 = arith.constant 0.0204081628 : f32
    %49 = vector.broadcast %cst_25 : f32 to vector<1x128xf32>
    %50 = arith.mulf %48, %49 : vector<1x128xf32>
    %51 = vector.broadcast %50 : vector<1x128xf32> to vector<49x128xf32>
    %52 = arith.subf %46, %51 : vector<49x128xf32>
    %53 = arith.mulf %52, %52 : vector<49x128xf32>
    %cst_26 = arith.constant dense<0.000000e+00> : vector<128xf32>
    %54 = vector.multi_reduction <add>, %53, %cst_26 [0] : vector<49x128xf32> to vector<128xf32>
    %55 = vector.shape_cast %54 : vector<128xf32> to vector<1x128xf32>
    %cst_27 = arith.constant 0.0204081628 : f32
    %56 = vector.broadcast %cst_27 : f32 to vector<1x128xf32>
    %57 = arith.mulf %55, %56 : vector<1x128xf32>
    %cst_28 = arith.constant 9.99999974E-6 : f32
    %58 = vector.broadcast %cst_28 : f32 to vector<1x128xf32>
    %59 = arith.addf %57, %58 : vector<1x128xf32>
    %60 = math.rsqrt %59 : vector<1x128xf32>
    %c0_29 = arith.constant 0 : index
    %c256_30 = arith.constant 256 : index
    %61 = vector.load %arg4[%c0_29, %c256_30] : memref<1x736xf32, #tpu.memory_space<vmem>>, vector<1x128xf32>
    %62 = arith.mulf %61, %60 : vector<1x128xf32>
    %c0_31 = arith.constant 0 : index
    %c256_32 = arith.constant 256 : index
    %63 = vector.load %arg5[%c0_31, %c256_32] : memref<1x736xf32, #tpu.memory_space<vmem>>, vector<1x128xf32>
    %64 = vector.broadcast %62 : vector<1x128xf32> to vector<49x128xf32>
    %65 = arith.mulf %52, %64 : vector<49x128xf32>
    %66 = vector.broadcast %63 : vector<1x128xf32> to vector<49x128xf32>
    %67 = arith.addf %65, %66 : vector<49x128xf32>
    %c0_33 = arith.constant 0 : index
    %c256_34 = arith.constant 256 : index
    %68 = vector.load %arg6[%c0_33, %c256_34] : memref<49x736xf32, #tpu.memory_space<vmem>>, vector<49x128xf32>
    tpu.vector_store %arg6[%c0_33, %c256_34], %67 {strides = array<i32>} : memref<49x736xf32, #tpu.memory_space<vmem>>, vector<49x128xf32>,
    %c0_35 = arith.constant 0 : index
    %c384 = arith.constant 384 : index
    %69 = vector.load %arg0[%c0_35, %c384] : memref<49x640xf32, #tpu.memory_space<vmem>>, vector<49x128xf32>
    %cst_36 = arith.constant dense<0.000000e+00> : vector<128xf32>
    %70 = vector.multi_reduction <add>, %69, %cst_36 [0] : vector<49x128xf32> to vector<128xf32>
    %71 = vector.shape_cast %70 : vector<128xf32> to vector<1x128xf32>
    %cst_37 = arith.constant 0.0204081628 : f32
    %72 = vector.broadcast %cst_37 : f32 to vector<1x128xf32>
    %73 = arith.mulf %71, %72 : vector<1x128xf32>
    %74 = vector.broadcast %73 : vector<1x128xf32> to vector<49x128xf32>
    %75 = arith.subf %69, %74 : vector<49x128xf32>
    %76 = arith.mulf %75, %75 : vector<49x128xf32>
    %cst_38 = arith.constant dense<0.000000e+00> : vector<128xf32>
    %77 = vector.multi_reduction <add>, %76, %cst_38 [0] : vector<49x128xf32> to vector<128xf32>
    %78 = vector.shape_cast %77 : vector<128xf32> to vector<1x128xf32>
    %cst_39 = arith.constant 0.0204081628 : f32
    %79 = vector.broadcast %cst_39 : f32 to vector<1x128xf32>
    %80 = arith.mulf %78, %79 : vector<1x128xf32>
    %cst_40 = arith.constant 9.99999974E-6 : f32
    %81 = vector.broadcast %cst_40 : f32 to vector<1x128xf32>
    %82 = arith.addf %80, %81 : vector<1x128xf32>
    %83 = math.rsqrt %82 : vector<1x128xf32>
    %c0_41 = arith.constant 0 : index
    %c384_42 = arith.constant 384 : index
    %84 = vector.load %arg4[%c0_41, %c384_42] : memref<1x736xf32, #tpu.memory_space<vmem>>, vector<1x128xf32>
    %85 = arith.mulf %84, %83 : vector<1x128xf32>
    %c0_43 = arith.constant 0 : index
    %c384_44 = arith.constant 384 : index
    %86 = vector.load %arg5[%c0_43, %c384_44] : memref<1x736xf32, #tpu.memory_space<vmem>>, vector<1x128xf32>
    %87 = vector.broadcast %85 : vector<1x128xf32> to vector<49x128xf32>
    %88 = arith.mulf %75, %87 : vector<49x128xf32>
    %89 = vector.broadcast %86 : vector<1x128xf32> to vector<49x128xf32>
    %90 = arith.addf %88, %89 : vector<49x128xf32>
    %c0_45 = arith.constant 0 : index
    %c384_46 = arith.constant 384 : index
    %91 = vector.load %arg6[%c0_45, %c384_46] : memref<49x736xf32, #tpu.memory_space<vmem>>, vector<49x128xf32>
    tpu.vector_store %arg6[%c0_45, %c384_46], %90 {strides = array<i32>} : memref<49x736xf32, #tpu.memory_space<vmem>>, vector<49x128xf32>,
    %c0_47 = arith.constant 0 : index
    %c512 = arith.constant 512 : index
    %92 = vector.load %arg0[%c0_47, %c512] : memref<49x640xf32, #tpu.memory_space<vmem>>, vector<49x128xf32>
    %cst_48 = arith.constant dense<0.000000e+00> : vector<128xf32>
    %93 = vector.multi_reduction <add>, %92, %cst_48 [0] : vector<49x128xf32> to vector<128xf32>
    %94 = vector.shape_cast %93 : vector<128xf32> to vector<1x128xf32>
    %cst_49 = arith.constant 0.0204081628 : f32
    %95 = vector.broadcast %cst_49 : f32 to vector<1x128xf32>
    %96 = arith.mulf %94, %95 : vector<1x128xf32>
    %97 = vector.broadcast %96 : vector<1x128xf32> to vector<49x128xf32>
    %98 = arith.subf %92, %97 : vector<49x128xf32>
    %99 = arith.mulf %98, %98 : vector<49x128xf32>
    %cst_50 = arith.constant dense<0.000000e+00> : vector<128xf32>
    %100 = vector.multi_reduction <add>, %99, %cst_50 [0] : vector<49x128xf32> to vector<128xf32>
    %101 = vector.shape_cast %100 : vector<128xf32> to vector<1x128xf32>
    %cst_51 = arith.constant 0.0204081628 : f32
    %102 = vector.broadcast %cst_51 : f32 to vector<1x128xf32>
    %103 = arith.mulf %101, %102 : vector<1x128xf32>
    %cst_52 = arith.constant 9.99999974E-6 : f32
    %104 = vector.broadcast %cst_52 : f32 to vector<1x128xf32>
    %105 = arith.addf %103, %104 : vector<1x128xf32>
    %106 = math.rsqrt %105 : vector<1x128xf32>
    %c0_53 = arith.constant 0 : index
    %c512_54 = arith.constant 512 : index
    %107 = vector.load %arg4[%c0_53, %c512_54] : memref<1x736xf32, #tpu.memory_space<vmem>>, vector<1x128xf32>
    %108 = arith.mulf %107, %106 : vector<1x128xf32>
    %c0_55 = arith.constant 0 : index
    %c512_56 = arith.constant 512 : index
    %109 = vector.load %arg5[%c0_55, %c512_56] : memref<1x736xf32, #tpu.memory_space<vmem>>, vector<1x128xf32>
    %110 = vector.broadcast %108 : vector<1x128xf32> to vector<49x128xf32>
    %111 = arith.mulf %98, %110 : vector<49x128xf32>
    %112 = vector.broadcast %109 : vector<1x128xf32> to vector<49x128xf32>
    %113 = arith.addf %111, %112 : vector<49x128xf32>
    %c0_57 = arith.constant 0 : index
    %c512_58 = arith.constant 512 : index
    %114 = vector.load %arg6[%c0_57, %c512_58] : memref<49x736xf32, #tpu.memory_space<vmem>>, vector<49x128xf32>
    tpu.vector_store %arg6[%c0_57, %c512_58], %113 {strides = array<i32>} : memref<49x736xf32, #tpu.memory_space<vmem>>, vector<49x128xf32>,
    %c0_59 = arith.constant 0 : index
    %c0_60 = arith.constant 0 : index
    %115 = vector.load %arg1[%c0_59, %c0_60] : memref<49x32xf32, #tpu.memory_space<vmem>>, vector<49x32xf32>
    %cst_61 = arith.constant dense<0.000000e+00> : vector<32xf32>
    %116 = vector.multi_reduction <add>, %115, %cst_61 [0] : vector<49x32xf32> to vector<32xf32>
    %117 = vector.shape_cast %116 : vector<32xf32> to vector<1x32xf32>
    %cst_62 = arith.constant 0.0204081628 : f32
    %118 = vector.broadcast %cst_62 : f32 to vector<1x32xf32>
    %119 = arith.mulf %117, %118 : vector<1x32xf32>
    %120 = vector.broadcast %119 : vector<1x32xf32> to vector<49x32xf32>
    %121 = arith.subf %115, %120 : vector<49x32xf32>
    %122 = arith.mulf %121, %121 : vector<49x32xf32>
    %cst_63 = arith.constant dense<0.000000e+00> : vector<32xf32>
    %123 = vector.multi_reduction <add>, %122, %cst_63 [0] : vector<49x32xf32> to vector<32xf32>
    %124 = vector.shape_cast %123 : vector<32xf32> to vector<1x32xf32>
    %cst_64 = arith.constant 0.0204081628 : f32
    %125 = vector.broadcast %cst_64 : f32 to vector<1x32xf32>
    %126 = arith.mulf %124, %125 : vector<1x32xf32>
    %cst_65 = arith.constant 9.99999974E-6 : f32
    %127 = vector.broadcast %cst_65 : f32 to vector<1x32xf32>
    %128 = arith.addf %126, %127 : vector<1x32xf32>
    %129 = math.rsqrt %128 : vector<1x32xf32>
    %c0_66 = arith.constant 0 : index
    %c640 = arith.constant 640 : index
    %130 = vector.load %arg4[%c0_66, %c640] : memref<1x736xf32, #tpu.memory_space<vmem>>, vector<1x32xf32>
    %131 = arith.mulf %130, %129 : vector<1x32xf32>
    %c0_67 = arith.constant 0 : index
    %c640_68 = arith.constant 640 : index
    %132 = vector.load %arg5[%c0_67, %c640_68] : memref<1x736xf32, #tpu.memory_space<vmem>>, vector<1x32xf32>
    %133 = vector.broadcast %131 : vector<1x32xf32> to vector<49x32xf32>
    %134 = arith.mulf %121, %133 : vector<49x32xf32>
    %135 = vector.broadcast %132 : vector<1x32xf32> to vector<49x32xf32>
    %136 = arith.addf %134, %135 : vector<49x32xf32>
    %c0_69 = arith.constant 0 : index
    %c640_70 = arith.constant 640 : index
    %137 = vector.load %arg6[%c0_69, %c640_70] : memref<49x736xf32, #tpu.memory_space<vmem>>, vector<49x32xf32>
    tpu.vector_store %arg6[%c0_69, %c640_70], %136 {strides = array<i32>} : memref<49x736xf32, #tpu.memory_space<vmem>>, vector<49x32xf32>,
    %c0_71 = arith.constant 0 : index
    %c0_72 = arith.constant 0 : index
    %138 = vector.load %arg2[%c0_71, %c0_72] : memref<49x32xf32, #tpu.memory_space<vmem>>, vector<49x32xf32>
    %cst_73 = arith.constant dense<0.000000e+00> : vector<32xf32>
    %139 = vector.multi_reduction <add>, %138, %cst_73 [0] : vector<49x32xf32> to vector<32xf32>
    %140 = vector.shape_cast %139 : vector<32xf32> to vector<1x32xf32>
    %cst_74 = arith.constant 0.0204081628 : f32
    %141 = vector.broadcast %cst_74 : f32 to vector<1x32xf32>
    %142 = arith.mulf %140, %141 : vector<1x32xf32>
    %143 = vector.broadcast %142 : vector<1x32xf32> to vector<49x32xf32>
    %144 = arith.subf %138, %143 : vector<49x32xf32>
    %145 = arith.mulf %144, %144 : vector<49x32xf32>
    %cst_75 = arith.constant dense<0.000000e+00> : vector<32xf32>
    %146 = vector.multi_reduction <add>, %145, %cst_75 [0] : vector<49x32xf32> to vector<32xf32>
    %147 = vector.shape_cast %146 : vector<32xf32> to vector<1x32xf32>
    %cst_76 = arith.constant 0.0204081628 : f32
    %148 = vector.broadcast %cst_76 : f32 to vector<1x32xf32>
    %149 = arith.mulf %147, %148 : vector<1x32xf32>
    %cst_77 = arith.constant 9.99999974E-6 : f32
    %150 = vector.broadcast %cst_77 : f32 to vector<1x32xf32>
    %151 = arith.addf %149, %150 : vector<1x32xf32>
    %152 = math.rsqrt %151 : vector<1x32xf32>
    %c0_78 = arith.constant 0 : index
    %c672 = arith.constant 672 : index
    %153 = vector.load %arg4[%c0_78, %c672] : memref<1x736xf32, #tpu.memory_space<vmem>>, vector<1x32xf32>
    %154 = arith.mulf %153, %152 : vector<1x32xf32>
    %c0_79 = arith.constant 0 : index
    %c672_80 = arith.constant 672 : index
    %155 = vector.load %arg5[%c0_79, %c672_80] : memref<1x736xf32, #tpu.memory_space<vmem>>, vector<1x32xf32>
    %156 = vector.broadcast %154 : vector<1x32xf32> to vector<49x32xf32>
    %157 = arith.mulf %144, %156 : vector<49x32xf32>
    %158 = vector.broadcast %155 : vector<1x32xf32> to vector<49x32xf32>
    %159 = arith.addf %157, %158 : vector<49x32xf32>
    %c0_81 = arith.constant 0 : index
    %c672_82 = arith.constant 672 : index
    %160 = vector.load %arg6[%c0_81, %c672_82] : memref<49x736xf32, #tpu.memory_space<vmem>>, vector<49x32xf32>
    tpu.vector_store %arg6[%c0_81, %c672_82], %159 {strides = array<i32>} : memref<49x736xf32, #tpu.memory_space<vmem>>, vector<49x32xf32>,
    %c0_83 = arith.constant 0 : index
    %c0_84 = arith.constant 0 : index
    %161 = vector.load %arg3[%c0_83, %c0_84] : memref<49x32xf32, #tpu.memory_space<vmem>>, vector<49x32xf32>
    %cst_85 = arith.constant dense<0.000000e+00> : vector<32xf32>
    %162 = vector.multi_reduction <add>, %161, %cst_85 [0] : vector<49x32xf32> to vector<32xf32>
    %163 = vector.shape_cast %162 : vector<32xf32> to vector<1x32xf32>
    %cst_86 = arith.constant 0.0204081628 : f32
    %164 = vector.broadcast %cst_86 : f32 to vector<1x32xf32>
    %165 = arith.mulf %163, %164 : vector<1x32xf32>
    %166 = vector.broadcast %165 : vector<1x32xf32> to vector<49x32xf32>
    %167 = arith.subf %161, %166 : vector<49x32xf32>
    %168 = arith.mulf %167, %167 : vector<49x32xf32>
    %cst_87 = arith.constant dense<0.000000e+00> : vector<32xf32>
    %169 = vector.multi_reduction <add>, %168, %cst_87 [0] : vector<49x32xf32> to vector<32xf32>
    %170 = vector.shape_cast %169 : vector<32xf32> to vector<1x32xf32>
    %cst_88 = arith.constant 0.0204081628 : f32
    %171 = vector.broadcast %cst_88 : f32 to vector<1x32xf32>
    %172 = arith.mulf %170, %171 : vector<1x32xf32>
    %cst_89 = arith.constant 9.99999974E-6 : f32
    %173 = vector.broadcast %cst_89 : f32 to vector<1x32xf32>
    %174 = arith.addf %172, %173 : vector<1x32xf32>
    %175 = math.rsqrt %174 : vector<1x32xf32>
    %c0_90 = arith.constant 0 : index
    %c704 = arith.constant 704 : index
    %176 = vector.load %arg4[%c0_90, %c704] : memref<1x736xf32, #tpu.memory_space<vmem>>, vector<1x32xf32>
    %177 = arith.mulf %176, %175 : vector<1x32xf32>
    %c0_91 = arith.constant 0 : index
    %c704_92 = arith.constant 704 : index
    %178 = vector.load %arg5[%c0_91, %c704_92] : memref<1x736xf32, #tpu.memory_space<vmem>>, vector<1x32xf32>
    %179 = vector.broadcast %177 : vector<1x32xf32> to vector<49x32xf32>
    %180 = arith.mulf %167, %179 : vector<49x32xf32>
    %181 = vector.broadcast %178 : vector<1x32xf32> to vector<49x32xf32>
    %182 = arith.addf %180, %181 : vector<49x32xf32>
    %c0_93 = arith.constant 0 : index
    %c704_94 = arith.constant 704 : index
    %183 = vector.load %arg6[%c0_93, %c704_94] : memref<49x736xf32, #tpu.memory_space<vmem>>, vector<49x32xf32>
    tpu.vector_store %arg6[%c0_93, %c704_94], %182 {strides = array<i32>} : memref<49x736xf32, #tpu.memory_space<vmem>>, vector<49x32xf32>,
    return
  }
}

</mosaic_0001>

<bundles_post_ra>
// kernel: tpu_custom_call.1
= control target key start
LH: loop header
LB: loop body
LE: loop exit
PB: predicated region body
PF: predicated region fallthrough
CT: control target
= control target key end

     0   :  { %11 = vsyncpa [#allocation3], 0  ;;  %s1717_s0 = inlined_call_operand.hbm [shape: f32[49,640], index: 0, kind: input, shape index: {}]   ;;  %s1718_s1 = inlined_call_operand.vmem [shape: f32[49,32], index: 1, kind: input, shape index: {}]   ;;  %s1719_s2 = inlined_call_operand.vmem [shape: f32[49,32], index: 2, kind: input, shape index: {}]   ;;  %s1720_s3 = inlined_call_operand.vmem [shape: f32[49,32], index: 3, kind: input, shape index: {}]   ;;  %s1721_s4 = inlined_call_operand.vmem [shape: f32[1,736], index: 4, kind: input, shape index: {}]   ;;  %s1722_s5 = inlined_call_operand.vmem [shape: f32[1,736], index: 5, kind: input, shape index: {}]   ;;  %s1723_s6 = inlined_call_operand.hbm [shape: f32[49,736], index: 6, kind: output, shape index: {}]  }
   0x1   :  { %12 = vsyncpa [#allocation4], 0  ;;  %s17_s23 = sshll.u32 %s1717_s0, 4  ;;  %s979_s24 = smov [#allocation2]   ;;  %s18_s23 = int_to_ptr.hbm [resolvable:$true] %s17_s23 }
   0x2   :  { %s19_s25 = sshll.u32 %s979_s24, 4  ;;  %s980_s26 = smov 640   ;;  %s20_s25 = int_to_ptr.vmem [resolvable:$true] %s19_s25 }
   0x3   :  { %s981_s27 = smov 40  }
   0x4   :  { %25 = dma.hbm_to_vmem [thread:$0]  %s18_s23, 4480, %s20_s25, [#allocation3], %s980_s26, %s980_s26, %s981_s27  }
   0x5   :  { %975 = dma.done.wait [#allocation3], 4480  }
   0x6   :  { %976 = vsyncadd [#allocation3], 4294962816  ;;  %vm498_vm0 = vcmask 261120   ;;  %v595_v0 = vld [vmem:[%s1719_s2] sm:$0xff]  ;;  %v596_v1 = vld [vmem:[%s1719_s2 + $0x8] sm:$0xff]  ;;  %vm510_vm1 = vcmask 253952  }
   0x7   :  { %v597_v2 = vld [vmem:[%s1719_s2 + $0x10] sm:$0xff]  ;;  %v598_v3 = vld [vmem:[%s1719_s2 + $0x18] sm:$0xff]  ;;  %v602_v4 = vsel %vm498_vm0, %v595_v0, 0.0  ;;  %v603_v5 = vsel %vm498_vm0, %v596_v1, 0.0  ;;  %v599_v7 = vld [vmem:[%s1719_s2 + $0x20] sm:$0xff]  ;;  %s983_s30 = smov 64  }
   0x8   :  { %v605_v6 = vsel %vm498_vm0, %v597_v2, 0.0  ;;  %v600_v8 = vld [vmem:[%s1719_s2 + $0x28] sm:$0xff]  ;;  %v604_v9 = vadd.f32 %v603_v5, %v602_v4  ;;  %v735_v10 = vld [vmem:[%s1720_s3] sm:$0xff]  ;;  %v607_v11 = vsel %vm498_vm0, %v598_v3, 0.0  ;;  %v737_v13 = vld [vmem:[%s1720_s3 + $0x10] sm:$0xff]  ;;  %v609_v20 = vsel %vm498_vm0, %v599_v7, 0.0 }
   0x9   :  { %v736_v12 = vld [vmem:[%s1720_s3 + $0x8] sm:$0xff]  ;;  %v738_v14 = vld [vmem:[%s1720_s3 + $0x18] sm:$0xff]  ;;  %v742_v15 = vsel %vm498_vm0, %v735_v10, 0.0  ;;  %v601_v16 = vld [vmem:[%s1719_s2 + $0x30] sm:$0x1]  ;;  %v745_v19 = vsel %vm498_vm0, %v737_v13, 0.0 }
   0xa   :  { %v606_v17 = vadd.f32 %v605_v6, %v604_v9  ;;  %v743_v18 = vsel %vm498_vm0, %v736_v12, 0.0  ;;  %v611_v21 = vsel %vm498_vm0, %v600_v8, 0.0  ;;  %v739_v22 = vld [vmem:[%s1720_s3 + $0x20] sm:$0xff]  ;;  %v740_v25 = vld [vmem:[%s1720_s3 + $0x28] sm:$0xff]  ;;  %v747_v26 = vsel %vm498_vm0, %v738_v14, 0.0  ;;  %s984_s0 = smov 96  }
   0xb   :  { %v744_v23 = vadd.f32 %v743_v18, %v742_v15  ;;  %v749_v29 = vsel %vm498_vm0, %v739_v22, 0.0  ;;  %v613_v30 = vsel %vm510_vm1, %v601_v16, 0.0  ;;  %v741_v31 = vld [vmem:[%s1720_s3 + $0x30] sm:$0x1]  ;;  %v751_v34 = vsel %vm498_vm0, %v740_v25, 0.0  ;;  %s982_s3 = smov 32  }
   0xc   :  { %v608_v24 = vadd.f32 %v607_v11, %v606_v17  ;;  %v753_v37 = vsel %vm510_vm1, %v741_v31, 0.0  ;;  %vm52_vm8 = vcmask 1040384   ;;  %vm726_vm12 = vcmask 523520   ;;  %s881_s27 = sshll.u32 %s1723_s6, 4  ;;  %s986_s28 = smov 768   ;;  %s882_s27 = int_to_ptr.hbm [resolvable:$true] %s881_s27 }
   0xd   :  { %v746_v27 = vadd.f32 %v745_v19, %v744_v23 }
   0xe   :  { %v610_v28 = vadd.f32 %v609_v20, %v608_v24 }
   0xf   :  { %v748_v32 = vadd.f32 %v747_v26, %v746_v27 }
  0x10   :  { %v612_v33 = vadd.f32 %v611_v21, %v610_v28 }
  0x11   :  { %v750_v35 = vadd.f32 %v749_v29, %v748_v32 }
  0x12   :  { %v614_v36 = vadd.f32 %v613_v30, %v612_v33 }
  0x13   :  { %v752_v38 = vadd.f32 %v751_v34, %v750_v35 }
  0x14   :  { %v615_v39 = vrot.slane %v614_v36, 4 }
  0x15   :  { %v754_v40 = vadd.f32 %v753_v37, %v752_v38 }
  0x16   :  { %v616_v41 = vadd.f32 %v615_v39, %v614_v36 }
  0x17   :  { %v755_v42 = vrot.slane %v754_v40, 4 }
  0x18   :  { %v617_v43 = vrot.slane %v616_v41, 2 }
  0x19   :  { %v756_v44 = vadd.f32 %v755_v42, %v754_v40 }
  0x1a   :  { %v618_v45 = vadd.f32 %v617_v43, %v616_v41 }
  0x1b   :  { %v757_v46 = vrot.slane %v756_v44, 2 }
  0x1c   :  { %v619_v47 = vrot.slane %v618_v45, 1 }
  0x1d   :  { %v758_v48 = vadd.f32 %v757_v46, %v756_v44 }
  0x1e   :  { %v620_v49 = vadd.f32 %v619_v47, %v618_v45 }
  0x1f   :  { %v759_v50 = vrot.slane %v758_v48, 1 }
  0x20   :  { %v621_v51 = vmul.f32 0.020408163, %v620_v49 }
  0x21   :  { %v760_v52 = vadd.f32 %v759_v50, %v758_v48 }
  0x22   :  { %v1082_v53 = vsub.f32 %v595_v0, %v621_v51  ;;  %v1084_v54 = vsub.f32 %v596_v1, %v621_v51  ;;  %v1086_v55 = vsub.f32 %v597_v2, %v621_v51  ;;  %v1088_v56 = vsub.f32 %v598_v3, %v621_v51 }
  0x23   :  { %v1090_v57 = vsub.f32 %v599_v7, %v621_v51  ;;  %v1092_v58 = vsub.f32 %v600_v8, %v621_v51  ;;  %v761_v59 = vmul.f32 0.020408163, %v760_v52  ;;  %v1102_v0 = vsub.f32 %v601_v16, %v621_v51 }
  0x24   :  { %v629_v60 = vmul.f32 %v1082_v53, %v1082_v53  ;;  %v630_v61 = vmul.f32 %v1084_v54, %v1084_v54  ;;  %v631_v62 = vmul.f32 %v1086_v55, %v1086_v55  ;;  %v632_v63 = vmul.f32 %v1088_v56, %v1088_v56 }
  0x25   :  { %v633_v1 = vmul.f32 %v1090_v57, %v1090_v57  ;;  %v1106_v2 = vsub.f32 %v735_v10, %v761_v59  ;;  %v634_v6 = vmul.f32 %v1092_v58, %v1092_v58  ;;  %v1114_v9 = vsub.f32 %v736_v12, %v761_v59 }
  0x26   :  { %v636_v3 = vsel %vm498_vm0, %v629_v60, 0.0  ;;  %v637_v4 = vsel %vm498_vm0, %v630_v61, 0.0  ;;  %v639_v5 = vsel %vm498_vm0, %v631_v62, 0.0  ;;  %v641_v8 = vsel %vm498_vm0, %v632_v63, 0.0 }
  0x27   :  { %v638_v7 = vadd.f32 %v637_v4, %v636_v3  ;;  %v1116_v11 = vsub.f32 %v737_v13, %v761_v59  ;;  %v1118_v15 = vsub.f32 %v738_v14, %v761_v59  ;;  %v1120_v10 = vsub.f32 %v739_v22, %v761_v59 }
  0x28   :  { %v635_v16 = vmul.f32 %v1102_v0, %v1102_v0  ;;  %v643_v18 = vsel %vm498_vm0, %v633_v1, 0.0  ;;  %v769_v19 = vmul.f32 %v1106_v2, %v1106_v2  ;;  %v1127_v20 = vsub.f32 %v740_v25, %v761_v59 }
  0x29   :  { %v640_v17 = vadd.f32 %v639_v5, %v638_v7  ;;  %v770_v12 = vmul.f32 %v1114_v9, %v1114_v9  ;;  %v771_v13 = vmul.f32 %v1116_v11, %v1116_v11  ;;  %v772_v14 = vmul.f32 %v1118_v15, %v1118_v15 }
  0x2a   :  { %v645_v22 = vsel %vm498_vm0, %v634_v6, 0.0  ;;  %v776_v23 = vsel %vm498_vm0, %v769_v19, 0.0  ;;  %v1137_v24 = vsub.f32 %v741_v31, %v761_v59  ;;  %v773_v25 = vmul.f32 %v1120_v10, %v1120_v10 }
  0x2b   :  { %v642_v21 = vadd.f32 %v641_v8, %v640_v17  ;;  %v777_v26 = vsel %vm498_vm0, %v770_v12, 0.0  ;;  %v779_v27 = vsel %vm498_vm0, %v771_v13, 0.0  ;;  %v647_v30 = vsel %vm510_vm1, %v635_v16, 0.0 }
  0x2c   :  { %v778_v29 = vadd.f32 %v777_v26, %v776_v23  ;;  %v774_v32 = vmul.f32 %v1127_v20, %v1127_v20  ;;  %v781_v33 = vsel %vm498_vm0, %v772_v14, 0.0  ;;  %v775_v31 = vmul.f32 %v1137_v24, %v1137_v24  ;;  %v903_v23 = vld [vmem:[%s1722_s5 + $0x5] ss:$0 sm:$0xff] }
  0x2d   :  { %v644_v28 = vadd.f32 %v643_v18, %v642_v21  ;;  %v783_v36 = vsel %vm498_vm0, %v773_v25, 0.0  ;;  %688 = vrot.lane.b32.xlu2 %v903_v23, %s984_s0  ;;  %v904_v25 = vld [vmem:[%s1722_s5 + $0x5] ss:$0 sm:$0xff] }
  0x2e   :  { %v780_v35 = vadd.f32 %v779_v27, %v778_v29  ;;  %v785_v39 = vsel %vm498_vm0, %v774_v32, 0.0  ;;  %v787_v42 = vsel %vm510_vm1, %v775_v31, 0.0  ;;  %v667_v26 = vld [vmem:[%s1721_s4 + $0x5] sm:$0x1]  ;;  %v492_v31 = vld [vmem:[%s1718_s1 + $0x8] sm:$0xff] }
  0x2f   :  { %v646_v34 = vadd.f32 %v645_v22, %v644_v28 }
  0x30   :  { %v782_v38 = vadd.f32 %v781_v33, %v780_v35  ;;  %v491_v35 = vld [vmem:[%s1718_s1] sm:$0xff] }
  0x31   :  { %v648_v37 = vadd.f32 %v647_v30, %v646_v34  ;;  %v807_v30 = vld [vmem:[%s1721_s4 + $0x5] sm:$0x1] }
  0x32   :  { %v784_v41 = vadd.f32 %v783_v36, %v782_v38  ;;  %v499_v36 = vsel %vm498_vm0, %v491_v35, 0.0  ;;  %v493_v38 = vld [vmem:[%s1718_s1 + $0x10] sm:$0xff] }
  0x33   :  { %v649_v40 = vrot.slane %v648_v37, 4 }
  0x34   :  { %v786_v44 = vadd.f32 %v785_v39, %v784_v41  ;;  %v494_v41 = vld [vmem:[%s1718_s1 + $0x18] sm:$0xff] }
  0x35   :  { %v650_v43 = vadd.f32 %v649_v40, %v648_v37  ;;  %828 = vrot.lane.b32.xlu2 %v904_v25, %s983_s30  ;;  %v500_v37 = vsel %vm498_vm0, %v492_v31, 0.0  ;;  %v502_v40 = vsel %vm498_vm0, %v493_v38, 0.0 }
  0x36   :  { %v788_v46 = vadd.f32 %v787_v42, %v786_v44  ;;  %v501_v39 = vadd.f32 %v500_v37, %v499_v36  ;;  %v495_v44 = vld [vmem:[%s1718_s1 + $0x20] sm:$0xff] }
  0x37   :  { %v651_v45 = vrot.slane %v650_v43, 2 }
  0x38   :  { %v789_v48 = vrot.slane %v788_v46, 4  ;;  %v503_v42 = vadd.f32 %v502_v40, %v501_v39 }
  0x39   :  { %v652_v47 = vadd.f32 %v651_v45, %v650_v43  ;;  %v504_v43 = vsel %vm498_vm0, %v494_v41, 0.0 }
  0x3a   :  { %v790_v50 = vadd.f32 %v789_v48, %v788_v46  ;;  %v505_v45 = vadd.f32 %v504_v43, %v503_v42  ;;  %v506_v46 = vsel %vm498_vm0, %v495_v44, 0.0 }
  0x3b   :  { %v653_v49 = vrot.slane %v652_v47, 1 }
  0x3c   :  { %v791_v52 = vrot.slane %v790_v50, 2  ;;  %v507_v48 = vadd.f32 %v506_v46, %v505_v45 }
  0x3d   :  { %v654_v51 = vadd.f32 %v653_v49, %v652_v47  ;;  %v496_v47 = vld [vmem:[%s1718_s1 + $0x28] sm:$0xff] }
  0x3e   :  { %v792_v60 = vadd.f32 %v791_v52, %v790_v50  ;;  %v508_v49 = vsel %vm498_vm0, %v496_v47, 0.0  ;;  %v497_v50 = vld [vmem:[%s1718_s1 + $0x30] sm:$0x1]  ;;  %s987_s1 = smov 48  }
  0x3f   :  { %v655_v59 = vmul.f32 0.020408163, %v654_v51  ;;  %v509_v51 = vadd.f32 %v508_v49, %v507_v48  ;;  %v511_v52 = vsel %vm510_vm1, %v497_v50, 0.0 }
  0x40   :  { %v793_v62 = vrot.slane %v792_v60, 1 }
  0x41   :  { %v656_v61 = vadd.f32 1e-05, %v655_v59  ;;  %v512_v59 = vadd.f32 %v511_v52, %v509_v51 }
  0x42   :  { %v794_v63 = vadd.f32 %v793_v62, %v792_v60 }
  0x43   :  { %911 = vrsqrt.f32 %v656_v61  ;;  %vm663_vm2 = vweird.f32 %v656_v61  ;;  %v513_v60 = vrot.slane %v512_v59, 4 }
  0x44   :  { %v795_v1 = vmul.f32 0.020408163, %v794_v63 }
  0x46   :  { %v796_v3 = vadd.f32 1e-05, %v795_v1 }
  0x48   :  { %913 = vrsqrt.f32 %v796_v3  ;;  %vm803_vm5 = vweird.f32 %v796_v3 }
  0x49   :  { %v912_v4 = vpop.eup %911 }
  0x4a   :  { %v658_v5 = vmul.f32 %v912_v4, %v656_v61  ;;  %vm664_vm3 = vweird.f32 %v912_v4  ;;  %v514_v61 = vadd.f32 %v513_v60, %v512_v59 }
  0x4b   :  { %vm665_vm4 = vmor %vm663_vm2, %vm664_vm3  ;;  %vm866_vm3 = vcmask 785920  }
  0x4c   :  { %v659_v6 = vmul.f32 %v912_v4, %v658_v5  ;;  %v515_v62 = vrot.slane %v514_v61, 2 }
  0x4e   :  { %v660_v7 = vmul.f32 0.5, %v659_v6  ;;  %v914_v8 = vpop.eup %913  ;;  %v516_v63 = vadd.f32 %v515_v62, %v514_v61 }
  0x4f   :  { %v798_v17 = vmul.f32 %v914_v8, %v796_v3  ;;  %vm804_vm6 = vweird.f32 %v914_v8 }
  0x50   :  { %v661_v16 = vsub.f32 1.5, %v660_v7  ;;  %vm805_vm7 = vmor %vm803_vm5, %vm804_vm6  ;;  %v517_v1 = vrot.slane %v516_v63, 1 }
  0x51   :  { %v799_v19 = vmul.f32 %v914_v8, %v798_v17 }
  0x52   :  { %v662_v18 = vmul.f32 %v912_v4, %v661_v16 }
  0x53   :  { %v800_v13 = vmul.f32 0.5, %v799_v19 }
  0x54   :  { %v666_v12 = vsel %vm665_vm4, %v912_v4, %v662_v18 }
  0x55   :  { %669 = vrot.lane.b32.xlu0 %v666_v12, %s982_s3  ;;  %v801_v14 = vsub.f32 1.5, %v800_v13 }
  0x57   :  { %v802_v21 = vmul.f32 %v914_v8, %v801_v14 }
  0x59   :  { %v806_v22 = vsel %vm805_vm7, %v914_v8, %v802_v21  ;;  %v518_v8 = vadd.f32 %v517_v1, %v516_v63  ;;  %vm733_vm7 = vcmask 516352  }
  0x5b   :  { %v519_v19 = vmul.f32 0.020408163, %v518_v8  ;;  %v1259_v8 = vld [vmem:[#allocation2 + $0x28] sm:$0xff] }
  0x5d   :  { %809 = vrot.lane.b32.xlu0 %v806_v22, %s983_s30  ;;  %v1202_v12 = vsub.f32 %v491_v35, %v519_v19  ;;  %v1204_v13 = vsub.f32 %v492_v31, %v519_v19  ;;  %v1209_v21 = vsub.f32 %v493_v38, %v519_v19  ;;  %v1213_v23 = vsub.f32 %v494_v41, %v519_v19 }
  0x5e   :  { %v1235_v36 = vsub.f32 %v497_v50, %v519_v19 }
  0x5f   :  { %v527_v22 = vmul.f32 %v1202_v12, %v1202_v12  ;;  %v528_v25 = vmul.f32 %v1204_v13, %v1204_v13 }
  0x60   :  { %1728 = vst [vmem:[#allocation8_spill] sm:$0xff] %v1235_v36  ;;  %v533_v43 = vmul.f32 %v1235_v36, %v1235_v36 }
  0x61   :  { %v535_v35 = vsel %vm498_vm0, %v528_v25, 0.0 }
  0x62   :  { %v545_v48 = vsel %vm510_vm1, %v533_v43, 0.0 }
  0x87   :  { %v689_v4 = vpop.permute.xlu2 %688 }
  0xc7   :  { %v670_v27 = vpop.permute.xlu0 %669 }
  0xc8   :  { %v672_v28 = vmul.f32 %v670_v27, %v667_v26 }
  0xca   :  { %v675_v29 = vperm.slane %v672_v28, 0 }
  0xcc   :  { %676 = vrot.lane.b32.xlu1 %v675_v29, %s984_s0  ;;  %v1218_v29 = vsub.f32 %v495_v44, %v519_v19 }
  0xcf   :  { %v810_v32 = vpop.permute.xlu0 %809 }
  0xd0   :  { %v812_v33 = vmul.f32 %v810_v32, %v807_v30  ;;  %v530_v30 = vmul.f32 %v1213_v23, %v1213_v23  ;;  %v534_v32 = vsel %vm498_vm0, %v527_v22, 0.0 }
  0xd1   :  { %v536_v37 = vadd.f32 %v535_v35, %v534_v32 }
  0xd2   :  { %v815_v34 = vperm.slane %v812_v33, 0  ;;  %v829_v33 = vpop.permute.xlu2 %828  ;;  %v539_v40 = vsel %vm498_vm0, %v530_v30, 0.0  ;;  %v1292_v30 = vld [vmem:[#allocation2 + $0x80] sm:$0xff] }
  0xd4   :  { %816 = vrot.lane.b32.xlu1 %v815_v34, %s983_s30  ;;  %v531_v34 = vmul.f32 %v1218_v29, %v1218_v29 }
  0xd6   :  { %v541_v44 = vsel %vm498_vm0, %v531_v34, 0.0 }
 0x13e   :  { %v677_v3 = vpop.permute.xlu1 %676 }
 0x13f   :  { %v681_v5 = vmul.f32 %v677_v3, %v1086_v55  ;;  %v679_v6 = vmul.f32 %v677_v3, %v1082_v53  ;;  %v680_v7 = vmul.f32 %v677_v3, %v1084_v54  ;;  %v684_v55 = vmul.f32 %v677_v3, %v1092_v58 }
 0x140   :  { %v682_v53 = vmul.f32 %v677_v3, %v1088_v56  ;;  %v683_v54 = vmul.f32 %v677_v3, %v1090_v57  ;;  %v1222_v56 = vsub.f32 %v496_v47, %v519_v19  ;;  %v529_v57 = vmul.f32 %v1209_v21, %v1209_v21  ;;  %v1268_v19 = vld [vmem:[#allocation2 + $0x10] sm:$0xff] }
 0x141   :  { %v693_v16 = vadd.f32 %v689_v4, %v681_v5  ;;  %v691_v17 = vadd.f32 %v689_v4, %v679_v6  ;;  %v692_v18 = vadd.f32 %v689_v4, %v680_v7  ;;  %v696_v26 = vadd.f32 %v689_v4, %v684_v55  ;;  %v1257_v7 = vld [vmem:[#allocation2] sm:$0xff]  ;;  %v1273_v55 = vld [vmem:[#allocation2 + $0x50] sm:$0xff] }
 0x142   :  { %v694_v27 = vadd.f32 %v689_v4, %v682_v53  ;;  %v695_v28 = vadd.f32 %v689_v4, %v683_v54  ;;  %v685_v31 = vmul.f32 %v677_v3, %v1102_v0  ;;  %v537_v38 = vsel %vm498_vm0, %v529_v57, 0.0  ;;  %v1275_v53 = vld [vmem:[#allocation2 + $0x58] sm:$0xff] }
 0x143   :  { %709 = vrot.lane.b32.xlu2 %v693_v16, %s982_s3  ;;  %705 = vrot.lane.b32.xlu0 %v691_v17, %s982_s3  ;;  %v532_v39 = vmul.f32 %v1222_v56, %v1222_v56  ;;  %v538_v42 = vadd.f32 %v537_v38, %v536_v37  ;;  %v1261_v16 = vld [vmem:[#allocation2 + $0x8] sm:$0xff]  ;;  %v1290_v57 = vld [vmem:[#allocation2 + $0x78] sm:$0xff]  ;;  %v1303_v37 = vld [vmem:[#allocation2 + $0x90] sm:$0xff] }
 0x144   :  { %707 = vrot.lane.b32.xlu1 %v692_v18, %s982_s3  ;;  %v697_v45 = vadd.f32 %v689_v4, %v685_v31  ;;  %v47_v18 = vadd.f32 %v1259_v8, %v1257_v7  ;;  %v1305_v38 = vld [vmem:[#allocation2 + $0xa0] sm:$0xff] }
 0x145   :  { %v540_v0 = vadd.f32 %v539_v40, %v538_v42  ;;  %v543_v46 = vsel %vm498_vm0, %v532_v39, 0.0  ;;  %v1307_v39 = vld [vmem:[#allocation2 + $0xa8] sm:$0xff] }
 0x146   :  { %v817_v14 = vpop.permute.xlu1 %816 }
 0x147   :  { %v820_v58 = vmul.f32 %v817_v14, %v1114_v9  ;;  %v819_v9 = vmul.f32 %v817_v14, %v1106_v2  ;;  %v542_v47 = vadd.f32 %v541_v44, %v540_v0  ;;  %v821_v49 = vmul.f32 %v817_v14, %v1116_v11  ;;  %v1316_v44 = vld [vmem:[#allocation2 + $0xb8] sm:$0xff]  ;;  %v1320_v0 = vld [vmem:[#allocation2 + $0x48] sm:$0xff] }
 0x148   :  { %v823_v50 = vmul.f32 %v817_v14, %v1120_v10  ;;  %v822_v52 = vmul.f32 %v817_v14, %v1118_v15  ;;  %v824_v3 = vmul.f32 %v817_v14, %v1127_v20  ;;  %v825_v10 = vmul.f32 %v817_v14, %v1137_v24  ;;  %v1266_v20 = vld [vmem:[#allocation2 + $0x30] sm:$0xff]  ;;  %v1270_v24 = vld [vmem:[#allocation2 + $0x38] sm:$0xff]  ;;  %v1279_v14 = vld [vmem:[#allocation2 + $0x60] sm:$0xff] }
 0x149   :  { %v832_v41 = vadd.f32 %v829_v33, %v820_v58  ;;  %v831_v2 = vadd.f32 %v829_v33, %v819_v9  ;;  %v544_v51 = vadd.f32 %v543_v46, %v542_v47  ;;  %v833_v60 = vadd.f32 %v829_v33, %v821_v49  ;;  %v1288_v58 = vld [vmem:[#allocation2 + $0x68] sm:$0xff]  ;;  %v1324_v47 = vld [vmem:[#allocation2 + $0xd0] sm:$0xff]  ;;  %v1327_v49 = vld [vmem:[#allocation2 + $0xd8] sm:$0xff] }
 0x14a   :  { %v835_v61 = vadd.f32 %v829_v33, %v823_v50  ;;  %v834_v63 = vadd.f32 %v829_v33, %v822_v52  ;;  %v836_v5 = vadd.f32 %v829_v33, %v824_v3  ;;  %v837_v6 = vadd.f32 %v829_v33, %v825_v10  ;;  %v1295_v33 = vld [vmem:[#allocation2 + $0x88] sm:$0xff] }
 0x14b   :  { %715 = vrot.lane.b32.xlu2 %v696_v26, %s982_s3  ;;  %711 = vrot.lane.b32.xlu0 %v694_v27, %s982_s3  ;;  %v546_v59 = vadd.f32 %v545_v48, %v544_v51  ;;  %v138_v54 = vadd.f32 %v1266_v20, %v1261_v16  ;;  %v228_v22 = vadd.f32 %v1270_v24, %v1268_v19  ;;  %v1284_v27 = vld [vmem:[#allocation2 + $0x18] sm:$0xff]  ;;  %v1322_v46 = vld [vmem:[#allocation2 + $0xc8] sm:$0xff] }
 0x14c   :  { %713 = vrot.lane.b32.xlu1 %v695_v28, %s982_s3  ;;  %v48_v26 = vadd.f32 %v47_v18, %v1273_v55  ;;  %v1286_v28 = vld [vmem:[#allocation2 + $0x40] sm:$0xff]  ;;  %v1355_v18 = vld [vmem:[#allocation2 + $0x98] sm:$0xff] }
 0x14d   :  { %v547_v62 = vrot.slane %v546_v59, 4  ;;  %v139_v32 = vadd.f32 %v138_v54, %v1275_v53  ;;  %v229_v9 = vadd.f32 %v228_v22, %v1279_v14  ;;  %v318_v34 = vadd.f32 %v1286_v28, %v1284_v27 }
 0x14e   :  { %v49_v31 = vadd.f32 %v48_v26, %v1290_v57 }
 0x14f   :  { %v548_v1 = vadd.f32 %v547_v62, %v546_v59  ;;  %v140_v40 = vadd.f32 %v139_v32, %v1292_v30  ;;  %v230_v42 = vadd.f32 %v229_v9, %v1295_v33  ;;  %v1333_v59 = vld [vmem:[#allocation2 + $0xf0] sm:$0x1]  ;;  %v1338_v62 = vld [vmem:[#allocation2 + $0xe0] sm:$0xff] }
 0x150   :  { %v50_v43 = vadd.f32 %v49_v31, %v1305_v38  ;;  %v1361_v31 = vld [vmem:[#allocation2 + $0xc0] sm:$0xff] }
 0x151   :  { %v549_v11 = vrot.slane %v548_v1, 2  ;;  %v141_v48 = vadd.f32 %v140_v40, %v1307_v39 }
 0x153   :  { %717 = vrot.lane.b32.xlu0 %v697_v45, %s982_s3  ;;  %847 = vrot.lane.b32.xlu2 %v832_v41, %s983_s30  ;;  %v550_v4 = vadd.f32 %v549_v11, %v548_v1  ;;  %v1310_v41 = vld [vmem:[#allocation2 + $0xb0] sm:$0xff]  ;;  %v1318_v45 = vld [vmem:[#allocation2 + $0x20] sm:$0xff]  ;;  %v142_v1 = vadd.f32 %v141_v48, %v1324_v47 }
 0x154   :  { %845 = vrot.lane.b32.xlu1 %v831_v2, %s983_s30  ;;  %v319_v2 = vadd.f32 %v318_v34, %v1288_v58  ;;  %v231_v50 = vadd.f32 %v230_v42, %v1310_v41  ;;  %v408_v52 = vadd.f32 %v1320_v0, %v1318_v45  ;;  %v1345_v11 = vld [vmem:[#allocation2 + $0x100] sm:$0x1] }
 0x155   :  { %v551_v15 = vrot.slane %v550_v4, 1 }
 0x156   :  { %v320_v51 = vadd.f32 %v319_v2, %v1303_v37  ;;  %v232_v10 = vadd.f32 %v231_v50, %v1327_v49 }
 0x157   :  { %v552_v17 = vadd.f32 %v551_v15, %v550_v4  ;;  %v1348_v4 = vld [vmem:[#allocation2 + $0x108] sm:$0x1]  ;;  %v233_v15 = vsel %vm52_vm8, %v1345_v11, 0.0 }
 0x158   :  { %v234_v22 = vadd.f32 %v233_v15, %v232_v10 }
 0x159   :  { %v553_v25 = vmul.f32 0.020408163, %v552_v17  ;;  %v1353_v17 = vld [vmem:[#allocation2 + $0x70] sm:$0xff] }
 0x15a   :  { %1729 = vst [vmem:[#allocation9_spill] sm:$0xff] %v1353_v17  ;;  %v409_v26 = vadd.f32 %v408_v52, %v1353_v17  ;;  %v235_v2 = vrot.slane %v234_v22, 4  ;;  %v1367_v52 = vld [vmem:[#allocation2 + $0x110] sm:$0x1] }
 0x15b   :  { %849 = vrot.lane.b32.xlu0 %v833_v60, %s983_s30  ;;  %853 = vrot.lane.b32.xlu2 %v835_v61, %s983_s30  ;;  %v1300_v35 = vadd.f32 1e-05, %v553_v25  ;;  %v51_v60 = vadd.f32 %v50_v43, %v1322_v46  ;;  %v1336_v61 = vld [vmem:[#allocation2 + $0xf8] sm:$0x1]  ;;  %v323_v25 = vsel %vm52_vm8, %v1348_v4, 0.0  ;;  %1731 = vst [vmem:[#allocation11_spill] sm:$0xff] %v1367_v52 }
 0x15c   :  { %851 = vrot.lane.b32.xlu1 %v834_v63, %s983_s30  ;;  %v53_v63 = vsel %vm52_vm8, %v1333_v59, 0.0  ;;  %v143_v3 = vsel %vm52_vm8, %v1336_v61, 0.0  ;;  %v410_v43 = vadd.f32 %v409_v26, %v1355_v18 }
 0x15d   :  { %915 = vrsqrt.f32 %v1300_v35  ;;  %v144_v54 = vadd.f32 %v143_v3, %v142_v1  ;;  %v236_v1 = vadd.f32 %v235_v2, %v234_v22  ;;  %vm561_vm9 = vweird.f32 %v1300_v35 }
 0x15e   :  { %v411_v3 = vadd.f32 %v410_v43, %v1361_v31 }
 0x15f   :  { %v145_v42 = vrot.slane %v144_v54, 4  ;;  %v237_v17 = vrot.slane %v236_v1, 2 }
 0x163   :  { %855 = vrot.lane.b32.xlu0 %v836_v5, %s983_s30  ;;  %v54_v5 = vadd.f32 %v53_v63, %v51_v60  ;;  %v916_v32 = vpop.eup %915  ;;  %v146_v63 = vadd.f32 %v145_v42, %v144_v54  ;;  %v413_v54 = vsel %vm52_vm8, %v1367_v52, 0.0 }
 0x164   :  { %857 = vrot.lane.b32.xlu1 %v837_v6, %s983_s30  ;;  %v321_v6 = vadd.f32 %v320_v51, %v1316_v44  ;;  %v556_v40 = vmul.f32 %v916_v32, %v1300_v35  ;;  %v1365_v51 = vld [vmem:[#allocation2 + $0xe8] sm:$0xff]  ;;  %vm562_vm10 = vweird.f32 %v916_v32 }
 0x165   :  { %v55_v9 = vrot.slane %v54_v5, 4  ;;  %1730 = vst [vmem:[#allocation10_spill] sm:$0xff] %v1365_v51  ;;  %v147_v36 = vrot.slane %v146_v63, 2  ;;  %vm563_vm11 = vmor %vm561_vm9, %vm562_vm10 }
 0x166   :  { %v322_v34 = vadd.f32 %v321_v6, %v1338_v62  ;;  %v557_v60 = vmul.f32 %v916_v32, %v556_v40 }
 0x167   :  { %v56_v48 = vadd.f32 %v55_v9, %v54_v5  ;;  %v412_v5 = vadd.f32 %v411_v3, %v1365_v51  ;;  %v148_v9 = vadd.f32 %v147_v36, %v146_v63 }
 0x168   :  { %v324_v50 = vadd.f32 %v323_v25, %v322_v34  ;;  %v558_v6 = vmul.f32 0.5, %v557_v60  ;;  %v238_v34 = vadd.f32 %v237_v17, %v236_v1  ;;  %v565_v60 = vld [vmem:[%s1721_s4 + $0x5] sm:$0x1] }
 0x169   :  { %v57_v10 = vrot.slane %v56_v48, 2  ;;  %v414_v40 = vadd.f32 %v413_v54, %v412_v5  ;;  %v149_v3 = vrot.slane %v148_v9, 1 }
 0x16a   :  { %v325_v15 = vrot.slane %v324_v50, 4  ;;  %v559_v22 = vsub.f32 1.5, %v558_v6 }
 0x16b   :  { %v58_v25 = vadd.f32 %v57_v10, %v56_v48  ;;  %v239_v48 = vrot.slane %v238_v34, 1  ;;  %v150_v6 = vadd.f32 %v149_v3, %v148_v9 }
 0x16c   :  { %v326_v26 = vadd.f32 %v325_v15, %v324_v50  ;;  %v560_v43 = vmul.f32 %v916_v32, %v559_v22  ;;  %v415_v15 = vrot.slane %v414_v40, 4  ;;  %v1384_v22 = vld [vmem:[%s1722_s5 + $0x5] ss:$0 sm:$0xff] }
 0x16d   :  { %v59_v42 = vrot.slane %v58_v25, 1  ;;  %v240_v36 = vadd.f32 %v239_v48, %v238_v34  ;;  %v151_v35 = vmul.f32 0.020408163, %v150_v6 }
 0x16e   :  { %v327_v2 = vrot.slane %v326_v26, 2  ;;  %v564_v52 = vsel %vm563_vm11, %v916_v32, %v560_v43  ;;  %v1392_v32 = vadd.f32 %v415_v15, %v414_v40  ;;  %vm873_vm11 = vcmask 778752  }
 0x16f   :  { %v60_v50 = vadd.f32 %v59_v42, %v58_v25  ;;  %v566_v17 = vmul.f32 %v565_v60, %v564_v52  ;;  %v241_v5 = vmul.f32 0.020408163, %v240_v36  ;;  %v1395_v52 = vsub.f32 %v1261_v16, %v151_v35 }
 0x170   :  { %v328_v10 = vadd.f32 %v327_v2, %v326_v26  ;;  %v1398_v26 = vsub.f32 %v1266_v20, %v151_v35  ;;  %v1413_v40 = vsub.f32 %v1275_v53, %v151_v35  ;;  %v1431_v3 = vsub.f32 %v1292_v30, %v151_v35 }
 0x171   :  { %v61_v63 = vmul.f32 0.020408163, %v60_v50  ;;  %v1379_v54 = vperm.slane %v566_v17, 0  ;;  %v1401_v9 = vsub.f32 %v1268_v19, %v241_v5  ;;  %v159_v20 = vmul.f32 %v1395_v52, %v1395_v52 }
 0x172   :  { %v329_v1 = vrot.slane %v328_v10, 1  ;;  %v160_v19 = vmul.f32 %v1398_v26, %v1398_v26  ;;  %v161_v48 = vmul.f32 %v1413_v40, %v1413_v40  ;;  %v1442_v15 = vsub.f32 %v1307_v39, %v151_v35 }
 0x173   :  { %v1387_v51 = vsub.f32 %v1257_v7, %v61_v63  ;;  %v1390_v25 = vsub.f32 %v1259_v8, %v61_v63  ;;  %v573_v42 = vmul.f32 %v1379_v54, %v1209_v21  ;;  %v1406_v7 = vsub.f32 %v1273_v55, %v61_v63 }
 0x174   :  { %v330_v34 = vadd.f32 %v329_v1, %v328_v10  ;;  %v1420_v21 = vsub.f32 %v1270_v24, %v241_v5  ;;  %v1424_v2 = vsub.f32 %v1290_v57, %v61_v63  ;;  %v576_v53 = vmul.f32 %v1379_v54, %v1222_v56 }
 0x175   :  { %v69_v8 = vmul.f32 %v1387_v51, %v1387_v51  ;;  %v70_v16 = vmul.f32 %v1390_v25, %v1390_v25  ;;  %v583_v55 = vadd.f32 %v1384_v22, %v573_v42  ;;  %v71_v43 = vmul.f32 %v1406_v7, %v1406_v7 }
 0x176   :  { %v166_v24 = vadd.f32 %v160_v19, %v159_v20  ;;  %v1437_v50 = vsub.f32 %v1305_v38, %v61_v63  ;;  %v72_v57 = vmul.f32 %v1424_v2, %v1424_v2  ;;  %v586_v56 = vadd.f32 %v1384_v22, %v576_v53 }
 0x177   :  { %v76_v60 = vadd.f32 %v70_v16, %v69_v8  ;;  %590 = vst.msk [vmem:[#allocation5 + $0x88] sm:$0xff] %vm498_vm0, %v583_v55  ;;  %v162_v30 = vmul.f32 %v1431_v3, %v1431_v3  ;;  %v1448_v36 = vsub.f32 %v1279_v14, %v241_v5  ;;  %v1451_v17 = vsub.f32 %v1322_v46, %v61_v63 }
 0x178   :  { %v167_v6 = vadd.f32 %v166_v24, %v161_v48  ;;  %v73_v38 = vmul.f32 %v1437_v50, %v1437_v50  ;;  %v1456_v42 = vsub.f32 %v1324_v47, %v151_v35  ;;  %593 = vst.msk [vmem:[#allocation5 + $0x118] sm:$0xff] %vm498_vm0, %v586_v56  ;;  %v1460_v39 = vsub.f32 %v1333_v59, %v61_v63 }
 0x179   :  { %v77_v10 = vadd.f32 %v76_v60, %v71_v43  ;;  %v1463_v8 = vsub.f32 %v1336_v61, %v151_v35  ;;  %v163_v14 = vmul.f32 %v1442_v15, %v1442_v15  ;;  %v74_v16 = vmul.f32 %v1451_v17, %v1451_v17 }
 0x17a   :  { %v168_v46 = vadd.f32 %v167_v6, %v162_v30  ;;  %v164_v47 = vmul.f32 %v1456_v42, %v1456_v42  ;;  %v1472_v19 = vsub.f32 %v1295_v33, %v241_v5  ;;  %v75_v59 = vmul.f32 %v1460_v39, %v1460_v39 }
 0x17b   :  { %v78_v1 = vadd.f32 %v77_v10, %v72_v57  ;;  %v165_v61 = vmul.f32 %v1463_v8, %v1463_v8  ;;  %v1479_v35 = vsub.f32 %v1310_v41, %v241_v5  ;;  %v1482_v43 = vsub.f32 %v1345_v11, %v241_v5 }
 0x17c   :  { %v169_v63 = vadd.f32 %v168_v46, %v163_v14  ;;  %v249_v60 = vmul.f32 %v1401_v9, %v1401_v9  ;;  %v250_v33 = vmul.f32 %v1420_v21, %v1420_v21  ;;  %v81_v53 = vsel %vm52_vm8, %v75_v59, 0.0 }
 0x17d   :  { %v79_v20 = vadd.f32 %v78_v1, %v73_v38  ;;  %v171_v24 = vsel %vm52_vm8, %v165_v61, 0.0  ;;  %v251_v57 = vmul.f32 %v1448_v36, %v1448_v36  ;;  %v1493_v10 = vsub.f32 %v1327_v49, %v241_v5 }
 0x17e   :  { %v170_v48 = vadd.f32 %v169_v63, %v164_v47  ;;  %v417_v11 = vrot.slane %v1392_v32, 2  ;;  %v252_v30 = vmul.f32 %v1472_v19, %v1472_v19  ;;  %v256_v6 = vadd.f32 %v250_v33, %v249_v60 }
 0x17f   :  { %v80_v55 = vadd.f32 %v79_v20, %v74_v16  ;;  %v331_v38 = vmul.f32 0.020408163, %v330_v34  ;;  %v255_v14 = vmul.f32 %v1482_v43, %v1482_v43  ;;  %v253_v16 = vmul.f32 %v1479_v35, %v1479_v35 }
 0x180   :  { %v172_v56 = vadd.f32 %v171_v24, %v170_v48  ;;  %v257_v20 = vadd.f32 %v256_v6, %v251_v57  ;;  %v254_v61 = vmul.f32 %v1493_v10, %v1493_v10 }
 0x181   :  { %v82_v41 = vadd.f32 %v81_v53, %v80_v55  ;;  %v1503_v49 = vsub.f32 %v1284_v27, %v331_v38  ;;  %v1506_v47 = vsub.f32 %v1286_v28, %v331_v38  ;;  %v1509_v59 = vsub.f32 %v1288_v58, %v331_v38 }
 0x182   :  { %v173_v46 = vrot.slane %v172_v56, 4  ;;  %v258_v63 = vadd.f32 %v257_v20, %v252_v30  ;;  %v418_v55 = vadd.f32 %v417_v11, %v1392_v32  ;;  %v261_v33 = vsel %vm52_vm8, %v255_v14, 0.0 }
 0x183   :  { %v83_v1 = vrot.slane %v82_v41, 4  ;;  %v339_v27 = vmul.f32 %v1503_v49, %v1503_v49  ;;  %v340_v28 = vmul.f32 %v1506_v47, %v1506_v47  ;;  %v572_v58 = vmul.f32 %v1379_v54, %v1204_v13 }
 0x184   :  { %v174_v34 = vadd.f32 %v173_v46, %v172_v56  ;;  %v571_v53 = vmul.f32 %v1379_v54, %v1202_v12  ;;  %v259_v24 = vadd.f32 %v258_v63, %v253_v16  ;;  %v1524_v32 = vsub.f32 %v1303_v37, %v331_v38 }
 0x185   :  { %v84_v5 = vadd.f32 %v83_v1, %v82_v41  ;;  %v1527_v41 = vsub.f32 %v1348_v4, %v331_v38  ;;  %v341_v11 = vmul.f32 %v1509_v59, %v1509_v59  ;;  %v582_v56 = vadd.f32 %v1384_v22, %v572_v58 }
 0x186   :  { %v175_v48 = vrot.slane %v174_v34, 2  ;;  %v581_v30 = vadd.f32 %v1384_v22, %v571_v53  ;;  %v260_v6 = vadd.f32 %v259_v24, %v254_v61  ;;  %v1534_v12 = vsub.f32 %v1316_v44, %v331_v38 }
 0x187   :  { %v85_v60 = vrot.slane %v84_v5, 2  ;;  %v1537_v14 = vsub.f32 %v1338_v62, %v331_v38  ;;  %589 = vst.msk [vmem:[#allocation5 + $0x58] sm:$0xff] %vm498_vm0, %v582_v56  ;;  %v346_v46 = vadd.f32 %v340_v28, %v339_v27  ;;  %v419_v16 = vrot.slane %v418_v55, 1 }
 0x188   :  { %v176_v13 = vadd.f32 %v175_v48, %v174_v34  ;;  %v262_v4 = vadd.f32 %v261_v33, %v260_v6  ;;  %588 = vst.msk [vmem:[#allocation5 + $0x28] sm:$0xff] %vm498_vm0, %v581_v30  ;;  %v345_v34 = vmul.f32 %v1527_v41, %v1527_v41  ;;  %v575_v27 = vmul.f32 %v1379_v54, %v1218_v29 }
 0x189   :  { %v86_v57 = vadd.f32 %v85_v60, %v84_v5  ;;  %v342_v5 = vmul.f32 %v1524_v32, %v1524_v32  ;;  %v347_v63 = vadd.f32 %v346_v46, %v341_v11  ;;  %v420_v62 = vadd.f32 %v419_v16, %v418_v55 }
 0x18a   :  { %v177_v37 = vrot.slane %v176_v13, 1  ;;  %v263_v61 = vrot.slane %v262_v4, 4  ;;  %v343_v60 = vmul.f32 %v1534_v12, %v1534_v12  ;;  %v344_v33 = vmul.f32 %v1537_v14, %v1537_v14 }
 0x18b   :  { %v87_v1 = vrot.slane %v86_v57, 1  ;;  %v574_v28 = vmul.f32 %v1379_v54, %v1213_v23  ;;  %v348_v24 = vadd.f32 %v347_v63, %v342_v5  ;;  %v351_v55 = vsel %vm52_vm8, %v345_v34, 0.0 }
 0x18c   :  { %v178_v44 = vadd.f32 %v177_v37, %v176_v13  ;;  %v264_v53 = vadd.f32 %v263_v61, %v262_v4  ;;  %v585_v11 = vadd.f32 %v1384_v22, %v575_v27  ;;  %v1732_v4 = vld [vmem:[#allocation9_spill] sm:$0xff]  ;;  %v1733_v61 = vld [vmem:[#allocation8_spill] sm:$0xff]  ;;  %v1734_v27 = vld [vmem:[#allocation10_spill] sm:$0xff] }
 0x18d   :  { %v88_v20 = vadd.f32 %v87_v1, %v86_v57  ;;  %v421_v57 = vmul.f32 0.020408163, %v420_v62  ;;  %v584_v56 = vadd.f32 %v1384_v22, %v574_v28  ;;  %v349_v29 = vadd.f32 %v348_v24, %v343_v60 }
 0x18e   :  { %v179_v58 = vmul.f32 0.020408163, %v178_v44  ;;  %v265_v13 = vrot.slane %v264_v53, 2  ;;  %592 = vst.msk [vmem:[#allocation5 + $0xe8] sm:$0xff] %vm498_vm0, %v585_v11  ;;  %v577_v63 = vmul.f32 %v1379_v54, %v1733_v61 }
 0x18f   :  { %v89_v38 = vmul.f32 0.020408163, %v88_v20  ;;  %v1562_v23 = vsub.f32 %v1318_v45, %v421_v57  ;;  %v1565_v1 = vsub.f32 %v1320_v0, %v421_v57  ;;  %v1570_v46 = vsub.f32 %v1732_v4, %v421_v57  ;;  %591 = vst.msk [vmem:[#allocation5 + $0xb8] sm:$0xff] %vm498_vm0, %v584_v56 }
 0x190   :  { %v1558_v30 = vadd.f32 1e-05, %v179_v58  ;;  %v266_v37 = vadd.f32 %v265_v13, %v264_v53  ;;  %v1573_v16 = vsub.f32 %v1355_v18, %v421_v57  ;;  %v350_v20 = vadd.f32 %v349_v29, %v344_v33  ;;  %v1735_v58 = vld [vmem:[#allocation11_spill] sm:$0xff] }
 0x191   :  { %v1553_v48 = vadd.f32 1e-05, %v89_v38  ;;  %v1577_v45 = vsub.f32 %v1361_v31, %v421_v57  ;;  %v429_v5 = vmul.f32 %v1562_v23, %v1562_v23  ;;  %v430_v34 = vmul.f32 %v1565_v1, %v1565_v1 }
 0x192   :  { %v267_v0 = vrot.slane %v266_v37, 1  ;;  %v431_v44 = vmul.f32 %v1570_v46, %v1570_v46  ;;  %v352_v18 = vadd.f32 %v351_v55, %v350_v20  ;;  %v432_v31 = vmul.f32 %v1573_v16, %v1573_v16 }
 0x193   :  { %917 = vrsqrt.f32 %v1553_v48  ;;  %v436_v38 = vadd.f32 %v430_v34, %v429_v5  ;;  %v1591_v28 = vsub.f32 %v1734_v27, %v421_v57  ;;  %v1594_v53 = vsub.f32 %v1735_v58, %v421_v57 }
 0x194   :  { %919 = vrsqrt.f32 %v1558_v30  ;;  %v268_v62 = vadd.f32 %v267_v0, %v266_v37  ;;  %v353_v33 = vrot.slane %v352_v18, 4  ;;  %v433_v24 = vmul.f32 %v1577_v45, %v1577_v45 }
 0x195   :  { %v587_v11 = vadd.f32 %v1384_v22, %v577_v63  ;;  %v437_v13 = vadd.f32 %v436_v38, %v431_v44  ;;  %v434_v22 = vmul.f32 %v1591_v28, %v1591_v28  ;;  %v435_v34 = vmul.f32 %v1594_v53, %v1594_v53 }
 0x196   :  { %v269_v56 = vmul.f32 0.020408163, %v268_v62  ;;  %v354_v37 = vadd.f32 %v353_v33, %v352_v18  ;;  %vm97_vm13 = vweird.f32 %v1553_v48  ;;  %vm187_vm15 = vweird.f32 %v1558_v30 }
 0x197   :  { %v438_v57 = vadd.f32 %v437_v13, %v432_v31  ;;  %594 = vst.msk [vmem:[#allocation5 + $0x148] sm:$0x1] %vm510_vm1, %v587_v11  ;;  %v441_v27 = vsel %vm52_vm8, %v435_v34, 0.0 }
 0x198   :  { %v1602_v20 = vadd.f32 1e-05, %v269_v56  ;;  %v355_v5 = vrot.slane %v354_v37, 2  ;;  %v101_v56 = vld [vmem:[%s1721_s4] sm:$0x1] }
 0x199   :  { %v918_v60 = vpop.eup %917  ;;  %v439_v18 = vadd.f32 %v438_v57, %v433_v24 }
 0x19a   :  { %v920_v55 = vpop.eup %919  ;;  %v92_v54 = vmul.f32 %v918_v60, %v1553_v48  ;;  %921 = vrsqrt.f32 %v1602_v20  ;;  %v356_v63 = vadd.f32 %v355_v5, %v354_v37  ;;  %vm98_vm14 = vweird.f32 %v918_v60  ;;  %v191_v48 = vld [vmem:[%s1721_s4 + $0x1] sm:$0x1] }
 0x19b   :  { %v182_v29 = vmul.f32 %v920_v55, %v1558_v30  ;;  %v440_v31 = vadd.f32 %v439_v18, %v434_v22  ;;  %vm99_vm0 = vmor %vm97_vm13, %vm98_vm14  ;;  %vm188_vm1 = vweird.f32 %v920_v55  ;;  %vm277_vm4 = vweird.f32 %v1602_v20 }
 0x19c   :  { %v93_v4 = vmul.f32 %v918_v60, %v92_v54  ;;  %v357_v33 = vrot.slane %v356_v63, 1  ;;  %vm189_vm2 = vmor %vm187_vm15, %vm188_vm1 }
 0x19d   :  { %v710_v6 = vpop.permute.xlu2 %709  ;;  %v183_v0 = vmul.f32 %v920_v55, %v182_v29  ;;  %v442_v37 = vadd.f32 %v441_v27, %v440_v31 }
 0x19e   :  { %729 = vst.msk [vmem:[#allocation5 + $0x88] sm:$0xff] %vm726_vm12, %v710_v6  ;;  %v94_v44 = vmul.f32 0.5, %v93_v4  ;;  %v358_v13 = vadd.f32 %v357_v33, %v356_v63 }
 0x19f   :  { %v184_v61 = vmul.f32 0.5, %v183_v0  ;;  %v443_v34 = vrot.slane %v442_v37, 4 }
 0x1a0   :  { %v95_v62 = vsub.f32 1.5, %v94_v44  ;;  %v1613_v54 = vpop.eup %921  ;;  %v359_v0 = vmul.f32 0.020408163, %v358_v13 }
 0x1a1   :  { %v185_v38 = vsub.f32 1.5, %v184_v61  ;;  %v272_v30 = vmul.f32 %v1613_v54, %v1602_v20  ;;  %v444_v27 = vadd.f32 %v443_v34, %v442_v37  ;;  %vm278_vm5 = vweird.f32 %v1613_v54 }
 0x1a2   :  { %v96_v58 = vmul.f32 %v918_v60, %v95_v62  ;;  %vm1646_vm6 = vmor %vm277_vm4, %vm278_vm5 }
 0x1a3   :  { %v186_v11 = vmul.f32 %v920_v55, %v185_v38  ;;  %v273_v18 = vmul.f32 %v1613_v54, %v272_v30 }
 0x1a4   :  { %v100_v24 = vsel %vm99_vm0, %v918_v60, %v96_v58 }
 0x1a5   :  { %v716_v6 = vpop.permute.xlu2 %715  ;;  %v190_v29 = vsel %vm189_vm2, %v920_v55, %v186_v11  ;;  %v906_v55 = vld [vmem:[%s1722_s5] ss:$0 sm:$0xff]  ;;  %v274_v58 = vmul.f32 0.5, %v273_v18 }
 0x1a6   :  { %732 = vst.msk [vmem:[#allocation5 + $0x118] sm:$0xff] %vm726_vm12, %v716_v6  ;;  %v102_v6 = vmul.f32 %v101_v56, %v100_v24  ;;  %v192_v57 = vmul.f32 %v191_v48, %v190_v29  ;;  %v281_v48 = vld [vmem:[%s1721_s4 + $0x2] sm:$0x1] }
 0x1a7   :  { %v275_v56 = vsub.f32 1.5, %v274_v58 }
 0x1a8   :  { %v105_v4 = vperm.slane %v102_v6, 0  ;;  %v195_v31 = vperm.slane %v192_v57, 0  ;;  %v907_v6 = vld [vmem:[%s1722_s5 + $0x1] ss:$0 sm:$0xff] }
 0x1aa   :  { %v107_v60 = vmul.f32 %v105_v4, %v1387_v51  ;;  %v108_v5 = vmul.f32 %v105_v4, %v1390_v25  ;;  %v109_v22 = vmul.f32 %v105_v4, %v1406_v7  ;;  %v110_v44 = vmul.f32 %v105_v4, %v1424_v2 }
 0x1ab   :  { %v111_v62 = vmul.f32 %v105_v4, %v1437_v50  ;;  %v1633_v7 = vadd.f32 1e-05, %v359_v0  ;;  %v112_v50 = vmul.f32 %v105_v4, %v1451_v17  ;;  %v113_v24 = vmul.f32 %v105_v4, %v1460_v39 }
 0x1ac   :  { %v117_v38 = vadd.f32 %v906_v55, %v107_v60  ;;  %v118_v25 = vadd.f32 %v906_v55, %v108_v5  ;;  %v119_v33 = vadd.f32 %v906_v55, %v109_v22  ;;  %v120_v2 = vadd.f32 %v906_v55, %v110_v44 }
 0x1ad   :  { %v848_v61 = vpop.permute.xlu2 %847  ;;  %v121_v11 = vadd.f32 %v906_v55, %v111_v62  ;;  %923 = vrsqrt.f32 %v1633_v7  ;;  %v197_v13 = vmul.f32 %v195_v31, %v1395_v52  ;;  %v445_v17 = vrot.slane %v444_v27, 2 }
 0x1ae   :  { %124 = vst [vmem:[#allocation5] sm:$0xff] %v117_v38  ;;  %v198_v29 = vmul.f32 %v195_v31, %v1398_v26  ;;  %v276_v39 = vmul.f32 %v1613_v54, %v275_v56  ;;  %v122_v52 = vadd.f32 %v906_v55, %v112_v50  ;;  %v199_v30 = vmul.f32 %v195_v31, %v1413_v40 }
 0x1af   :  { %125 = vst [vmem:[#allocation5 + $0x30] sm:$0xff] %v118_v25  ;;  %v446_v4 = vadd.f32 %v445_v17, %v444_v27  ;;  %v123_v0 = vadd.f32 %v906_v55, %v113_v24  ;;  %v207_v5 = vadd.f32 %v907_v6, %v197_v13  ;;  %v200_v40 = vmul.f32 %v195_v31, %v1431_v3 }
 0x1b0   :  { %126 = vst [vmem:[#allocation5 + $0x60] sm:$0xff] %v119_v33  ;;  %v280_v26 = vsel %vm1646_vm6, %v1613_v54, %v276_v39  ;;  %v208_v18 = vadd.f32 %v907_v6, %v198_v29  ;;  %v209_v55 = vadd.f32 %v907_v6, %v199_v30  ;;  %v202_v54 = vmul.f32 %v195_v31, %v1456_v42 }
 0x1b1   :  { %127 = vst [vmem:[#allocation5 + $0x90] sm:$0xff] %v120_v2  ;;  %v282_v22 = vmul.f32 %v281_v48, %v280_v26  ;;  %v447_v34 = vrot.slane %v446_v4, 1  ;;  %v203_v38 = vmul.f32 %v195_v31, %v1463_v8  ;;  %v210_v25 = vadd.f32 %v907_v6, %v200_v40 }
 0x1b2   :  { %128 = vst [vmem:[#allocation5 + $0xc0] sm:$0xff] %v121_v11  ;;  %v212_v50 = vadd.f32 %v907_v6, %v202_v54  ;;  %vm367_vm8 = vweird.f32 %v1633_v7 }
 0x1b3   :  { %v924_v44 = vpop.eup %923  ;;  %129 = vst [vmem:[#allocation5 + $0xf0] sm:$0xff] %v122_v52 }
 0x1b4   :  { %v362_v62 = vmul.f32 %v924_v44, %v1633_v7  ;;  %130 = vst [vmem:[#allocation5 + $0x120] sm:$0x1] %v123_v0  ;;  %vm368_vm9 = vweird.f32 %v924_v44 }
 0x1b5   :  { %v706_v63 = vpop.permute.xlu0 %705  ;;  %v854_v60 = vpop.permute.xlu2 %853  ;;  %214 = vst [vmem:[#allocation5 + $0x8] sm:$0xff] %v207_v5  ;;  %vm1676_vm10 = vmor %vm367_vm8, %vm368_vm9 }
 0x1b6   :  { %v708_v51 = vpop.permute.xlu1 %707  ;;  %727 = vst.msk [vmem:[#allocation5 + $0x28] sm:$0xff] %vm726_vm12, %v706_v63  ;;  %v285_v63 = vperm.slane %v282_v22, 0  ;;  %v363_v33 = vmul.f32 %v924_v44, %v362_v62 }
 0x1b7   :  { %728 = vst.msk [vmem:[#allocation5 + $0x58] sm:$0xff] %vm726_vm12, %v708_v51  ;;  %v448_v51 = vadd.f32 %v447_v34, %v446_v4 }
 0x1b8   :  { %868 = vst.msk [vmem:[#allocation5 + $0x58] sm:$0xff] %vm866_vm3, %v848_v61  ;;  %v201_v61 = vmul.f32 %v195_v31, %v1442_v15  ;;  %v287_v3 = vmul.f32 %v285_v63, %v1401_v9  ;;  %v908_v15 = vld [vmem:[%s1722_s5 + $0x2] ss:$0 sm:$0xff]  ;;  %v288_v58 = vmul.f32 %v285_v63, %v1420_v21  ;;  %v364_v8 = vmul.f32 0.5, %v363_v33 }
 0x1b9   :  { %215 = vst [vmem:[#allocation5 + $0x38] sm:$0xff] %v208_v18  ;;  %v213_v9 = vadd.f32 %v907_v6, %v203_v38  ;;  %v449_v31 = vmul.f32 0.020408163, %v448_v51  ;;  %v289_v11 = vmul.f32 %v285_v63, %v1448_v36  ;;  %v290_v13 = vmul.f32 %v285_v63, %v1472_v19 }
 0x1ba   :  { %v211_v2 = vadd.f32 %v907_v6, %v201_v61  ;;  %216 = vst [vmem:[#allocation5 + $0x68] sm:$0xff] %v209_v55  ;;  %v297_v24 = vadd.f32 %v908_v15, %v287_v3  ;;  %v365_v56 = vsub.f32 1.5, %v364_v8  ;;  %v298_v21 = vadd.f32 %v908_v15, %v288_v58  ;;  %v371_v6 = vld [vmem:[%s1721_s4 + $0x3] sm:$0x1] }
 0x1bb   :  { %217 = vst [vmem:[#allocation5 + $0x98] sm:$0xff] %v210_v25  ;;  %v450_v17 = vadd.f32 1e-05, %v449_v31  ;;  %v291_v7 = vmul.f32 %v285_v63, %v1479_v35  ;;  %v292_v36 = vmul.f32 %v285_v63, %v1493_v10  ;;  %v293_v19 = vmul.f32 %v285_v63, %v1482_v43  ;;  %v909_v43 = vld [vmem:[%s1722_s5 + $0x3] ss:$0 sm:$0xff] }
 0x1bc   :  { %218 = vst [vmem:[#allocation5 + $0xc8] sm:$0xff] %v211_v2  ;;  %v366_v29 = vmul.f32 %v924_v44, %v365_v56  ;;  %v299_v39 = vadd.f32 %v908_v15, %v289_v11  ;;  %v300_v52 = vadd.f32 %v908_v15, %v290_v13 }
 0x1bd   :  { %v712_v37 = vpop.permute.xlu0 %711  ;;  %219 = vst [vmem:[#allocation5 + $0xf8] sm:$0xff] %v212_v50  ;;  %925 = vrsqrt.f32 %v450_v17  ;;  %v301_v4 = vadd.f32 %v908_v15, %v291_v7  ;;  %v303_v0 = vadd.f32 %v908_v15, %v293_v19 }
 0x1be   :  { %v714_v57 = vpop.permute.xlu1 %713  ;;  %730 = vst.msk [vmem:[#allocation5 + $0xb8] sm:$0xff] %vm726_vm12, %v712_v37  ;;  %v370_v48 = vsel %vm1676_vm10, %v924_v44, %v366_v29 }
 0x1bf   :  { %731 = vst.msk [vmem:[#allocation5 + $0xe8] sm:$0xff] %vm726_vm12, %v714_v57  ;;  %v372_v35 = vmul.f32 %v371_v6, %v370_v48  ;;  %v302_v57 = vadd.f32 %v908_v15, %v292_v36  ;;  %vm457_vm12 = vweird.f32 %v450_v17 }
 0x1c0   :  { %871 = vst.msk [vmem:[#allocation5 + $0xe8] sm:$0xff] %vm866_vm3, %v854_v60 }
 0x1c1   :  { %220 = vst [vmem:[#allocation5 + $0x128] sm:$0x1] %v213_v9  ;;  %v375_v10 = vperm.slane %v372_v35, 0 }
 0x1c2   :  { %304 = vst [vmem:[#allocation5 + $0x10] sm:$0xff] %v297_v24 }
 0x1c3   :  { %305 = vst [vmem:[#allocation5 + $0x40] sm:$0xff] %v298_v21  ;;  %v926_v26 = vpop.eup %925  ;;  %v377_v60 = vmul.f32 %v375_v10, %v1503_v49  ;;  %v378_v5 = vmul.f32 %v375_v10, %v1506_v47  ;;  %v379_v22 = vmul.f32 %v375_v10, %v1509_v59  ;;  %v380_v34 = vmul.f32 %v375_v10, %v1524_v32 }
 0x1c4   :  { %306 = vst [vmem:[#allocation5 + $0x70] sm:$0xff] %v299_v39  ;;  %v452_v44 = vmul.f32 %v926_v26, %v450_v17  ;;  %v381_v40 = vmul.f32 %v375_v10, %v1534_v12  ;;  %v382_v61 = vmul.f32 %v375_v10, %v1537_v14  ;;  %v383_v49 = vmul.f32 %v375_v10, %v1527_v41  ;;  %v461_v41 = vld [vmem:[%s1721_s4 + $0x4] sm:$0x1]  ;;  %s985_s4 = smov [#allocation5]  }
 0x1c5   :  { %v718_v27 = vpop.permute.xlu0 %717  ;;  %307 = vst [vmem:[#allocation5 + $0xa0] sm:$0xff] %v300_v52  ;;  %v387_v18 = vadd.f32 %v909_v43, %v377_v60  ;;  %v388_v55 = vadd.f32 %v909_v43, %v378_v5  ;;  %v389_v47 = vadd.f32 %v909_v43, %v379_v22  ;;  %v390_v32 = vadd.f32 %v909_v43, %v380_v34 }
 0x1c6   :  { %v846_v42 = vpop.permute.xlu1 %845  ;;  %734 = vst.msk [vmem:[#allocation5 + $0x148] sm:$0x1] %vm733_vm7, %v718_v27  ;;  %v453_v63 = vmul.f32 %v926_v26, %v452_v44  ;;  %vm458_vm13 = vweird.f32 %v926_v26  ;;  %v391_v12 = vadd.f32 %v909_v43, %v381_v40  ;;  %v392_v38 = vadd.f32 %v909_v43, %v382_v61  ;;  %v910_v27 = vld [vmem:[%s1722_s5 + $0x4] ss:$0 sm:$0xff]  ;;  %s879_s5 = sshll.u32 %s985_s4, 4  ;;  %s880_s5 = int_to_ptr.vmem [resolvable:$true] %s879_s5 }
 0x1c7   :  { %867 = vst.msk [vmem:[#allocation5 + $0x28] sm:$0xff] %vm866_vm3, %v846_v42  ;;  %v393_v14 = vadd.f32 %v909_v43, %v383_v49  ;;  %vm459_vm14 = vmor %vm457_vm12, %vm458_vm13 }
 0x1c8   :  { %308 = vst [vmem:[#allocation5 + $0xd0] sm:$0xff] %v301_v4  ;;  %v454_v54 = vmul.f32 0.5, %v453_v63 }
 0x1c9   :  { %309 = vst [vmem:[#allocation5 + $0x100] sm:$0xff] %v302_v57 }
 0x1ca   :  { %310 = vst [vmem:[#allocation5 + $0x130] sm:$0x1] %v303_v0  ;;  %v455_v51 = vsub.f32 1.5, %v454_v54 }
 0x1cb   :  { %394 = vst [vmem:[#allocation5 + $0x18] sm:$0xff] %v387_v18 }
 0x1cc   :  { %395 = vst [vmem:[#allocation5 + $0x48] sm:$0xff] %v388_v55  ;;  %v456_v25 = vmul.f32 %v926_v26, %v455_v51 }
 0x1cd   :  { %v850_v37 = vpop.permute.xlu0 %849  ;;  %396 = vst [vmem:[#allocation5 + $0x78] sm:$0xff] %v389_v47 }
 0x1ce   :  { %v852_v30 = vpop.permute.xlu1 %851  ;;  %869 = vst.msk [vmem:[#allocation5 + $0x88] sm:$0xff] %vm866_vm3, %v850_v37  ;;  %v460_v3 = vsel %vm459_vm14, %v926_v26, %v456_v25 }
 0x1cf   :  { %870 = vst.msk [vmem:[#allocation5 + $0xb8] sm:$0xff] %vm866_vm3, %v852_v30  ;;  %v462_v15 = vmul.f32 %v461_v41, %v460_v3 }
 0x1d0   :  { %397 = vst [vmem:[#allocation5 + $0xa8] sm:$0xff] %v390_v32 }
 0x1d1   :  { %398 = vst [vmem:[#allocation5 + $0xd8] sm:$0xff] %v391_v12  ;;  %v465_v33 = vperm.slane %v462_v15, 0 }
 0x1d2   :  { %399 = vst [vmem:[#allocation5 + $0x108] sm:$0xff] %v392_v38 }
 0x1d3   :  { %400 = vst [vmem:[#allocation5 + $0x138] sm:$0x1] %v393_v14  ;;  %v467_v2 = vmul.f32 %v465_v33, %v1562_v23  ;;  %v468_v58 = vmul.f32 %v465_v33, %v1565_v1  ;;  %v469_v42 = vmul.f32 %v465_v33, %v1570_v46  ;;  %v470_v50 = vmul.f32 %v465_v33, %v1573_v16 }
 0x1d4   :  { %v471_v8 = vmul.f32 %v465_v33, %v1577_v45  ;;  %v472_v9 = vmul.f32 %v465_v33, %v1591_v28  ;;  %v473_v31 = vmul.f32 %v465_v33, %v1594_v53 }
 0x1d5   :  { %v856_v62 = vpop.permute.xlu0 %855  ;;  %v477_v11 = vadd.f32 %v910_v27, %v467_v2  ;;  %v478_v24 = vadd.f32 %v910_v27, %v468_v58  ;;  %v479_v56 = vadd.f32 %v910_v27, %v469_v42  ;;  %v480_v13 = vadd.f32 %v910_v27, %v470_v50 }
 0x1d6   :  { %v858_v59 = vpop.permute.xlu1 %857  ;;  %872 = vst.msk [vmem:[#allocation5 + $0x118] sm:$0xff] %vm866_vm3, %v856_v62  ;;  %v481_v21 = vadd.f32 %v910_v27, %v471_v8  ;;  %v482_v23 = vadd.f32 %v910_v27, %v472_v9  ;;  %v483_v1 = vadd.f32 %v910_v27, %v473_v31 }
 0x1d7   :  { %874 = vst.msk [vmem:[#allocation5 + $0x148] sm:$0x1] %vm873_vm11, %v858_v59 }
 0x1d8   :  { %484 = vst [vmem:[#allocation5 + $0x20] sm:$0xff] %v477_v11 }
 0x1d9   :  { %485 = vst [vmem:[#allocation5 + $0x50] sm:$0xff] %v478_v24 }
 0x1da   :  { %486 = vst [vmem:[#allocation5 + $0x80] sm:$0xff] %v479_v56 }
 0x1db   :  { %487 = vst [vmem:[#allocation5 + $0xb0] sm:$0xff] %v480_v13 }
 0x1dc   :  { %488 = vst [vmem:[#allocation5 + $0xe0] sm:$0xff] %v481_v21 }
 0x1dd   :  { %489 = vst [vmem:[#allocation5 + $0x110] sm:$0xff] %v482_v23 }
 0x1de   :  { %490 = vst [vmem:[#allocation5 + $0x140] sm:$0x1] %v483_v1 }
 0x1df   :  { %887 = dma.vmem_to_hbm [thread:$0]  %s880_s5, 5376, %s882_s27, [#allocation4], %s986_s28, %s986_s28, %s987_s1  }
 0x1e0   :  { %977 = dma.done.wait [#allocation4], 5376  }
 0x1e1   :  { %978 = vsyncadd [#allocation4], 4294961920 }
 0x1e2   :  { %892 = vsyncpa [#allocation3], 1 }
 0x1e3   :  { %893 = vsyncpa [#allocation4], 1 }

</bundles_post_ra>
